<compile_context>
chip_gen: v7x
topology: tpu7x:2x2x1
jax: 0.10.0
libtpu: 0.0.40
codegen_flags: <defaults>
</compile_context>

<pallas_src>
import functools

import jax
import jax.numpy as jnp
from jax import lax
from jax.experimental import pallas as pl
from jax.experimental.pallas import tpu as pltpu


def autopad(k, p=None, d=1):
    """Same autopad logic as ultralytics."""
    if d > 1:
        k = d * (k - 1) + 1 if isinstance(k, int) else [d * (x - 1) + 1 for x in k]
    if p is None:
        p = k // 2 if isinstance(k, int) else [x // 2 for x in k]
    return p


def _round_up(x, m):
    return ((x + m - 1) // m) * m


def _vmem_info():
    """(physical VMEM bytes, per-tile budget, target matmul M) per generation."""
    cap = 64 << 20                        # conservative default (v7x: 64 MiB/TC)
    try:
        cap = int(getattr(pltpu.get_tpu_info(), "vmem_capacity_bytes", cap)) or cap
    except Exception:
        pass
    if cap >= (100 << 20):                # v5e / v6e: 128 MiB physical VMEM
        return cap, 48 << 20, 1024
    return cap, 22 << 20, 512             # v7x: 64 MiB physical VMEM


def _tile_vmem_est(TH, Wp, C1, C2p, k, s, d, W_out):
    """VMEM bytes for one grid step (incl. double-buffered pipelined blocks)."""
    TH_in = (TH - 1) * s + d * (k - 1) + 1
    M = TH * W_out
    est = 2 * (TH_in * Wp * C1 * 2        # input row block(s), bf16, dbl-buffered
               + k * k * C1 * C2p * 2     # folded weight (bf16)
               + C2p * 4                  # folded bias (f32)
               + M * C2p * 2)             # bf16 output block
    est += TH_in * Wp * C1 * 2            # assembled input window value
    est += M * C2p * 4                    # f32 matmul accumulator value
    est += M * C1 * 2                     # transient tap patch
    return est


def _pick_tile_h(H_out, W_out, Wp, C1, C2p, k, s, d, N, hal_div, budget, target_m):
    """Pick TH = output rows per grid step.

    Constraints / preferences:
      * TH % hal_div == 0 (so the fixed-size halo BlockSpec indexes in-bounds)
      * fits the generation-aware VMEM budget
      * prefer TH*W_out % 8 == 0 (no sublane relayout on the flat reshapes)
      * prefer M = TH*W_out >= target_m (amortize per-step overhead)
      * when N is odd, prefer an even number of H tiles (v7x megacore balance)
    """
    feas = [th for th in range(1, H_out + 1)
            if th % hal_div == 0
            and _tile_vmem_est(th, Wp, C1, C2p, k, s, d, W_out) <= budget]
    if not feas:
        # Even the smallest legal tile misses the budget (extreme shapes):
        # fall back to the smallest legal TH; vmem_limit below still clamps to
        # the physical cap.  # TODO(synk): tile W as well for such shapes.
        return max(hal_div, 1)

    aligned = [th for th in feas if (th * W_out) % 8 == 0]
    pool = aligned if aligned else feas
    big = [th for th in pool if th * W_out >= target_m]
    th = min(big) if big else max(pool)

    if N % 2 == 1:                                   # v7x megacore balance
        def tiles(t):
            return pl.cdiv(H_out, t)
        if tiles(th) % 2 == 1:
            even = [t for t in pool if t <= th and tiles(t) % 2 == 0]
            if even:
                th = max(even)
    return th


# ----------------------------------------------------------------------------
# Kernel bodies
# ----------------------------------------------------------------------------

def _tap_patch(x, kh, kw, *, s, d, TH, W_out, C1):
    """(TH, W_out, C1) window of x = (TH_in, Wp, C1) for conv tap (kh, kw)."""
    h0, w0 = kh * d, kw * d
    if s == 1:
        return x[h0:h0 + TH, w0:w0 + W_out, :]
    # TODO(synk): s > 1 path (strided slices, XLU gathers) is not exercised by
    # the tests below.
    return lax.slice(x, (h0, w0, 0),
                     (h0 + (TH - 1) * s + 1, w0 + (W_out - 1) * s + 1, C1),
                     (s, s, 1))


def _conv_tile(x, w_ref, b_ref, o_ref, *, k, s, d, TH, W_out, C1, M, act):
    """Fused conv + folded-BN bias + SiLU on one assembled input window.

    x:     (TH_in, Wp, C1)  bf16 input window (value)
    w_ref: (k*k, C1, C2p)   bf16 folded weights, tap-major
    b_ref: (1, C2p)         f32 folded BN bias
    o_ref: (1, 1, M, C2p)   bf16 flat lane-dense output block
    """
    acc = None
    for kh in range(k):                       # static tap loop -> one basic block
        for kw in range(k):
            patch = _tap_patch(x, kh, kw, s=s, d=d, TH=TH, W_out=W_out,
                               C1=C1).reshape(M, C1)
            contrib = jnp.dot(patch, w_ref[kh * k + kw],
                              preferred_element_type=jnp.float32)
            acc = contrib if acc is None else acc + contrib

    y = acc + b_ref[0]                        # folded BatchNorm bias (f32)
    if act:
        y = y * jax.nn.sigmoid(y)             # SiLU (sigmoid runs on the EUP slot)
    o_ref[0, 0] = y.astype(o_ref.dtype)       # bf16, unmasked lane-dense store


def _make_split_kernel(hal, params):
    """s == 1 path: non-overlapping main block (+ optional halo block)."""
    if hal > 0:
        def kernel(xm_ref, xh_ref, w_ref, b_ref, o_ref):
            # One concat along the (untiled) row dim assembles the TH_in window.
            x = jnp.concatenate([xm_ref[0], xh_ref[0]], axis=0)
            _conv_tile(x, w_ref, b_ref, o_ref, **params)
    else:
        def kernel(xm_ref, w_ref, b_ref, o_ref):
            _conv_tile(xm_ref[0], w_ref, b_ref, o_ref, **params)
    return kernel


def _make_gather_kernel(params):
    """s > 1 fallback: overlapping row tiles pre-gathered in the wrapper."""
    def kernel(x_ref, w_ref, b_ref, o_ref):
        _conv_tile(x_ref[0, 0], w_ref, b_ref, o_ref, **params)
    return kernel


# ----------------------------------------------------------------------------
# Wrapper
# ----------------------------------------------------------------------------

def conv_bn_silu(x_nchw, weight, gamma, beta, running_mean, running_var,
                 *, k=1, s=1, p=None, g=1, d=1, act=True, eps=1e-5,
                 out_dtype=jnp.bfloat16):
    """Forward of ultralytics Conv (eval-mode BN). NCHW in / NCHW out.

    out_dtype defaults to bf16 (halves HBM writeback); pass jnp.float32 to match
    the torch module's dtype exactly.
    """
    if g != 1:
        # TODO(synk): grouped conv (g > 1) not implemented; g=1 only.
        raise NotImplementedError("grouped conv (g > 1) not implemented")

    N, C1, H, W = x_nchw.shape
    C2 = weight.shape[0]
    pad = autopad(k, p, d)
    H_out = (H + 2 * pad - d * (k - 1) - 1) // s + 1
    W_out = (W + 2 * pad - d * (k - 1) - 1) // s + 1
    C2p = _round_up(C2, 128)                      # lane-dense output channels
    act_flag = act is True

    # ---- Fold eval-mode BatchNorm into conv weight + bias (JAX glue) --------
    scale = (gamma / jnp.sqrt(running_var + eps)).astype(jnp.float32)      # (C2,)
    bias = beta.astype(jnp.float32) - running_mean.astype(jnp.float32) * scale
    w_f = weight.astype(jnp.float32) * scale[:, None, None, None]          # OIHW
    # (C2,C1,k,k) -> (k,k,C1,C2) -> (k*k, C1, C2p), taps ordered (kh, kw).
    w_taps = jnp.transpose(w_f, (2, 3, 1, 0)).reshape(k * k * C1, C2)
    w_taps = jnp.pad(w_taps, ((0, 0), (0, C2p - C2))).astype(jnp.bfloat16)
    w_taps = w_taps.reshape(k * k, C1, C2p)
    bias_p = jnp.pad(bias, (0, C2p - C2)).reshape(1, C2p)

    # ---- Layout: NCHW -> NHWC bf16 (channels on lanes), spatial zero-pad ----
    x_nhwc = jnp.transpose(x_nchw, (0, 2, 3, 1)).astype(jnp.bfloat16)
    x_pad = jnp.pad(x_nhwc, ((0, 0), (pad, pad), (pad, pad), (0, 0)))
    Hp, Wp = x_pad.shape[1], x_pad.shape[2]

    # ---- Generation-aware tiling over output rows ---------------------------
    vmem_cap, budget, target_m = _vmem_info()
    hal = d * (k - 1)                 # halo rows needed below each main block
    split = (s == 1)                  # overlap-free main+halo specs (no HBM dup)
    hal_div = hal if (split and hal > 0) else 1
    TH = _pick_tile_h(H_out, W_out, Wp, C1, C2p, k, s, d, N, hal_div,
                      budget, target_m)
    TH_in = (TH - 1) * s + d * (k - 1) + 1
    H_tiles = pl.cdiv(H_out, TH)
    M = TH * W_out

    params = dict(k=k, s=s, d=d, TH=TH, W_out=W_out, C1=C1, M=M, act=act_flag)

    if split:
        # Pad rows so both the TH-sized main blocks and the hal-sized halo
        # blocks index in-bounds with plain Blocked BlockSpecs (TH % hal == 0).
        H_rows = (H_tiles + (1 if hal > 0 else 0)) * TH
        x_in = jnp.pad(x_pad, ((0, 0), (0, H_rows - Hp), (0, 0), (0, 0)))
        in_specs = [pl.BlockSpec((1, TH, Wp, C1), lambda n, h: (n, h, 0, 0))]
        operands = [x_in]
        if hal > 0:
            blk = TH // hal           # halo block index units of `hal` rows
            in_specs.append(pl.BlockSpec(
                (1, hal, Wp, C1), lambda n, h: (n, (h + 1) * blk, 0, 0)))
            operands.append(x_in)     # same HBM buffer, second (tiny) view
        kernel = _make_split_kernel(hal, params)
        in_rows_per_step = TH + hal
    else:
        # s > 1 fallback: materialize overlapping halo row tiles once in HBM.
        # TODO(synk): s > 1 could also avoid this duplication with a strided
        # main+halo layout; not needed for the SPDBlock convs exercised here.
        row_idx = (jnp.arange(H_tiles) * (TH * s))[:, None] + jnp.arange(TH_in)[None, :]
        row_idx = jnp.minimum(row_idx, Hp - 1)   # clamped rows feed dropped rows
        x_tiles = x_pad[:, row_idx]              # (N, H_tiles, TH_in, Wp, C1)
        in_specs = [pl.BlockSpec((1, 1, TH_in, Wp, C1),
                                 lambda n, h: (n, h, 0, 0, 0))]
        operands = [x_tiles]
        kernel = _make_gather_kernel(params)
        in_rows_per_step = TH_in

    in_specs.append(pl.BlockSpec((k * k, C1, C2p), lambda n, h: (0, 0, 0)))
    in_specs.append(pl.BlockSpec((1, C2p), lambda n, h: (0, 0)))
    operands += [w_taps, bias_p]
    # TODO(synk): single-buffer the constant weight/bias blocks
    # (pipeline_mode=pl.Buffered(1)) to reclaim VMEM once that path is verified.

    # ---- VMEM limit: never above physical capacity minus headroom -----------
    vmem_est = _tile_vmem_est(TH, Wp, C1, C2p, k, s, d, W_out)
    vmem_limit = int(min(vmem_cap - (12 << 20),
                         max(32 << 20, int(vmem_est * 1.25) + (2 << 20))))

    flops = 2 * N * H_out * W_out * C2 * k * k * C1
    bytes_accessed = (N * H_tiles * in_rows_per_step * Wp * C1 * 2
                      + k * k * C1 * C2p * 2 + C2p * 4
                      + N * H_tiles * M * C2p * 2)

    out_flat = pl.pallas_call(
        kernel,
        out_shape=jax.ShapeDtypeStruct((N, H_tiles, M, C2p), jnp.bfloat16),
        grid_spec=pltpu.PrefetchScalarGridSpec(
            num_scalar_prefetch=0,
            grid=(N, H_tiles),
            in_specs=in_specs,
            out_specs=pl.BlockSpec((1, 1, M, C2p), lambda n, h: (n, h, 0, 0)),
        ),
        compiler_params=pltpu.CompilerParams(
            dimension_semantics=("parallel", "parallel"),
            vmem_limit_bytes=vmem_limit),
        cost_estimate=pl.CostEstimate(
            flops=flops,
            transcendentals=(N * H_tiles * M * C2p) if act_flag else 0,
            bytes_accessed=bytes_accessed),
    )(*operands)

    # (N, H_tiles, TH*W_out, C2p) -> NHWC (free reshape), drop padding, -> NCHW.
    out = out_flat.reshape(N, H_tiles * TH, W_out, C2p)[:, :H_out, :, :C2]
    out = jnp.transpose(out, (0, 3, 1, 2))        # bf16 transpose (half-cost)
    return out.astype(out_dtype)


# ----------------------------------------------------------------------------
# Pure-JAX reference
# ----------------------------------------------------------------------------

def _reference(x_nchw, weight, gamma, beta, running_mean, running_var,
               *, k=3, s=1, p=None, d=1, eps=1e-5):
    pad = autopad(k, p, d)
    y = lax.conv_general_dilated(
        x_nchw.astype(jnp.float32), weight.astype(jnp.float32),
        window_strides=(s, s), padding=[(pad, pad), (pad, pad)],
        rhs_dilation=(d, d),
        dimension_numbers=("NCHW", "OIHW", "NCHW"))
    scale = gamma / jnp.sqrt(running_var + eps)
    bias = beta - running_mean * scale
    y = y * scale.reshape(1, -1, 1, 1) + bias.reshape(1, -1, 1, 1)
    return y * jax.nn.sigmoid(y)


if __name__ == "__main__":
    key = jax.random.PRNGKey(0)
    kx, kw_, kg, kb, km, kv = jax.random.split(key, 6)

    # --- primary check: 3x3 conv, small C1 (main SPDBlock-style shape) -------
    N, C1, C2, H, W = 2, 4, 8, 16, 16
    K, S, D = 3, 1, 1
    x = jax.random.normal(kx, (N, C1, H, W), dtype=jnp.float32)
    weight = jax.random.normal(kw_, (C2, C1, K, K), dtype=jnp.float32) * 0.1
    gamma = 1.0 + 0.1 * jax.random.normal(kg, (C2,), dtype=jnp.float32)
    beta = 0.1 * jax.random.normal(kb, (C2,), dtype=jnp.float32)
    rmean = 0.1 * jax.random.normal(km, (C2,), dtype=jnp.float32)
    rvar = jnp.abs(1.0 + 0.1 * jax.random.normal(kv, (C2,), dtype=jnp.float32))

    out = conv_bn_silu(x, weight, gamma, beta, rmean, rvar, k=K, s=S, d=D)
    out = jax.block_until_ready(out)
    ref = _reference(x, weight, gamma, beta, rmean, rvar, k=K, s=S, d=D)
    assert out.shape == (N, C2, H, W), out.shape
    # bf16 activations/weights/output -> loosened tolerance.
    assert jnp.allclose(out.astype(jnp.float32), ref, atol=5e-2, rtol=5e-2), \
        float(jnp.max(jnp.abs(out.astype(jnp.float32) - ref)))

    # --- secondary check: 1x1 conv, wide C1, odd batch (no-halo + megacore) ---
    N2, C1b, C2b, H2, W2 = 1, 128, 64, 8, 8
    k2 = jax.random.split(jax.random.PRNGKey(1), 6)
    x2 = jax.random.normal(k2[0], (N2, C1b, H2, W2), dtype=jnp.float32)
    w2 = jax.random.normal(k2[1], (C2b, C1b, 1, 1), dtype=jnp.float32) * 0.1
    g2 = 1.0 + 0.1 * jax.random.normal(k2[2], (C2b,), dtype=jnp.float32)
    b2 = 0.1 * jax.random.normal(k2[3], (C2b,), dtype=jnp.float32)
    m2 = 0.1 * jax.random.normal(k2[4], (C2b,), dtype=jnp.float32)
    v2 = jnp.abs(1.0 + 0.1 * jax.random.normal(k2[5], (C2b,), dtype=jnp.float32))
    out2 = conv_bn_silu(x2, w2, g2, b2, m2, v2, k=1, s=1, d=1)
    out2 = jax.block_until_ready(out2)
    ref2 = _reference(x2, w2, g2, b2, m2, v2, k=1, s=1, d=1)
    assert out2.shape == (N2, C2b, H2, W2), out2.shape
    assert jnp.allclose(out2.astype(jnp.float32), ref2, atol=5e-2, rtol=5e-2), \
        float(jnp.max(jnp.abs(out2.astype(jnp.float32) - ref2)))

    print("KERNEL_OK")
</pallas_src>

<mosaic_0001>
module attributes {stable_mosaic.version = 11 : i64} {
  func.func @kernel(%arg0: i32, %arg1: i32, %arg2: memref<1x16x18x4xbf16, #tpu.memory_space<vmem>>, %arg3: memref<1x2x18x4xbf16, #tpu.memory_space<vmem>>, %arg4: memref<9x4x128xbf16, #tpu.memory_space<vmem>>, %arg5: memref<1x128xf32, #tpu.memory_space<vmem>>, %arg6: memref<1x1x256x128xbf16, #tpu.memory_space<vmem>>) attributes {dimension_semantics = [#tpu.dimension_semantics<parallel>, #tpu.dimension_semantics<parallel>], iteration_bounds = array<i64: 2, 1>, scalar_prefetch = 0 : i64, scratch_operands = 0 : i64, tpu.core_type = #tpu.core_type<tc>, window_params = [{transform_indices = @transform_0, window_bounds = array<i64: 1, 16, 18, 4>}, {transform_indices = @transform_1, window_bounds = array<i64: 1, 2, 18, 4>}, {pipeline_mode = #tpu.pipeline_mode<synchronous>, transform_indices = @transform_2, window_bounds = array<i64: 9, 4, 128>}, {pipeline_mode = #tpu.pipeline_mode<synchronous>, transform_indices = @transform_3, window_bounds = array<i64: 1, 128>}, {transform_indices = @transform_4, window_bounds = array<i64: 1, 1, 256, 128>}]} {
    %c0 = arith.constant 0 : index
    %c0_0 = arith.constant 0 : index
    %c0_1 = arith.constant 0 : index
    %c0_2 = arith.constant 0 : index
    %0 = vector.load %arg2[%c0, %c0_0, %c0_1, %c0_2] : memref<1x16x18x4xbf16, #tpu.memory_space<vmem>>, vector<1x16x18x4xbf16>
    %1 = vector.shape_cast %0 : vector<1x16x18x4xbf16> to vector<16x18x4xbf16>
    %c0_3 = arith.constant 0 : index
    %c0_4 = arith.constant 0 : index
    %c0_5 = arith.constant 0 : index
    %c0_6 = arith.constant 0 : index
    %2 = vector.load %arg3[%c0_3, %c0_4, %c0_5, %c0_6] : memref<1x2x18x4xbf16, #tpu.memory_space<vmem>>, vector<1x2x18x4xbf16>
    %3 = vector.shape_cast %2 : vector<1x2x18x4xbf16> to vector<2x18x4xbf16>
    %4 = tpu.concatenate %1, %3 in 0 : vector<16x18x4xbf16>, vector<2x18x4xbf16> -> vector<18x18x4xbf16>
    %5 = vector.extract_strided_slice %4 {offsets = [0, 0, 0], sizes = [16, 16, 4], strides = [1, 1, 1]} : vector<18x18x4xbf16> to vector<16x16x4xbf16>
    %6 = vector.shape_cast %5 : vector<16x16x4xbf16> to vector<256x4xbf16>
    %c0_7 = arith.constant 0 : index
    %c0_8 = arith.constant 0 : index
    %c0_9 = arith.constant 0 : index
    %7 = vector.load %arg4[%c0_7, %c0_8, %c0_9] : memref<9x4x128xbf16, #tpu.memory_space<vmem>>, vector<1x4x128xbf16>
    %8 = vector.shape_cast %7 : vector<1x4x128xbf16> to vector<4x128xbf16>
    %cst = arith.constant dense<0.000000e+00> : vector<256x128xf32>
    %9 = tpu.matmul %6, %8, %cst {dimension_numbers = #tpu.dot_dimension_numbers<[1], [0], [0], [1], [0, 0, 1, 1], [], []>} : vector<256x4xbf16>, vector<4x128xbf16>, vector<256x128xf32> -> vector<256x128xf32>
    %10 = vector.extract_strided_slice %4 {offsets = [0, 1, 0], sizes = [16, 16, 4], strides = [1, 1, 1]} : vector<18x18x4xbf16> to vector<16x16x4xbf16>
    %11 = vector.shape_cast %10 : vector<16x16x4xbf16> to vector<256x4xbf16>
    %c1 = arith.constant 1 : index
    %c0_10 = arith.constant 0 : index
    %c0_11 = arith.constant 0 : index
    %12 = vector.load %arg4[%c1, %c0_10, %c0_11] : memref<9x4x128xbf16, #tpu.memory_space<vmem>>, vector<1x4x128xbf16>
    %13 = vector.shape_cast %12 : vector<1x4x128xbf16> to vector<4x128xbf16>
    %cst_12 = arith.constant dense<0.000000e+00> : vector<256x128xf32>
    %14 = tpu.matmul %11, %13, %cst_12 {dimension_numbers = #tpu.dot_dimension_numbers<[1], [0], [0], [1], [0, 0, 1, 1], [], []>} : vector<256x4xbf16>, vector<4x128xbf16>, vector<256x128xf32> -> vector<256x128xf32>
    %15 = arith.addf %9, %14 : vector<256x128xf32>
    %16 = vector.extract_strided_slice %4 {offsets = [0, 2, 0], sizes = [16, 16, 4], strides = [1, 1, 1]} : vector<18x18x4xbf16> to vector<16x16x4xbf16>
    %17 = vector.shape_cast %16 : vector<16x16x4xbf16> to vector<256x4xbf16>
    %c2 = arith.constant 2 : index
    %c0_13 = arith.constant 0 : index
    %c0_14 = arith.constant 0 : index
    %18 = vector.load %arg4[%c2, %c0_13, %c0_14] : memref<9x4x128xbf16, #tpu.memory_space<vmem>>, vector<1x4x128xbf16>
    %19 = vector.shape_cast %18 : vector<1x4x128xbf16> to vector<4x128xbf16>
    %cst_15 = arith.constant dense<0.000000e+00> : vector<256x128xf32>
    %20 = tpu.matmul %17, %19, %cst_15 {dimension_numbers = #tpu.dot_dimension_numbers<[1], [0], [0], [1], [0, 0, 1, 1], [], []>} : vector<256x4xbf16>, vector<4x128xbf16>, vector<256x128xf32> -> vector<256x128xf32>
    %21 = arith.addf %15, %20 : vector<256x128xf32>
    %22 = vector.extract_strided_slice %4 {offsets = [1, 0, 0], sizes = [16, 16, 4], strides = [1, 1, 1]} : vector<18x18x4xbf16> to vector<16x16x4xbf16>
    %23 = vector.shape_cast %22 : vector<16x16x4xbf16> to vector<256x4xbf16>
    %c3 = arith.constant 3 : index
    %c0_16 = arith.constant 0 : index
    %c0_17 = arith.constant 0 : index
    %24 = vector.load %arg4[%c3, %c0_16, %c0_17] : memref<9x4x128xbf16, #tpu.memory_space<vmem>>, vector<1x4x128xbf16>
    %25 = vector.shape_cast %24 : vector<1x4x128xbf16> to vector<4x128xbf16>
    %cst_18 = arith.constant dense<0.000000e+00> : vector<256x128xf32>
    %26 = tpu.matmul %23, %25, %cst_18 {dimension_numbers = #tpu.dot_dimension_numbers<[1], [0], [0], [1], [0, 0, 1, 1], [], []>} : vector<256x4xbf16>, vector<4x128xbf16>, vector<256x128xf32> -> vector<256x128xf32>
    %27 = arith.addf %21, %26 : vector<256x128xf32>
    %28 = vector.extract_strided_slice %4 {offsets = [1, 1, 0], sizes = [16, 16, 4], strides = [1, 1, 1]} : vector<18x18x4xbf16> to vector<16x16x4xbf16>
    %29 = vector.shape_cast %28 : vector<16x16x4xbf16> to vector<256x4xbf16>
    %c4 = arith.constant 4 : index
    %c0_19 = arith.constant 0 : index
    %c0_20 = arith.constant 0 : index
    %30 = vector.load %arg4[%c4, %c0_19, %c0_20] : memref<9x4x128xbf16, #tpu.memory_space<vmem>>, vector<1x4x128xbf16>
    %31 = vector.shape_cast %30 : vector<1x4x128xbf16> to vector<4x128xbf16>
    %cst_21 = arith.constant dense<0.000000e+00> : vector<256x128xf32>
    %32 = tpu.matmul %29, %31, %cst_21 {dimension_numbers = #tpu.dot_dimension_numbers<[1], [0], [0], [1], [0, 0, 1, 1], [], []>} : vector<256x4xbf16>, vector<4x128xbf16>, vector<256x128xf32> -> vector<256x128xf32>
    %33 = arith.addf %27, %32 : vector<256x128xf32>
    %34 = vector.extract_strided_slice %4 {offsets = [1, 2, 0], sizes = [16, 16, 4], strides = [1, 1, 1]} : vector<18x18x4xbf16> to vector<16x16x4xbf16>
    %35 = vector.shape_cast %34 : vector<16x16x4xbf16> to vector<256x4xbf16>
    %c5 = arith.constant 5 : index
    %c0_22 = arith.constant 0 : index
    %c0_23 = arith.constant 0 : index
    %36 = vector.load %arg4[%c5, %c0_22, %c0_23] : memref<9x4x128xbf16, #tpu.memory_space<vmem>>, vector<1x4x128xbf16>
    %37 = vector.shape_cast %36 : vector<1x4x128xbf16> to vector<4x128xbf16>
    %cst_24 = arith.constant dense<0.000000e+00> : vector<256x128xf32>
    %38 = tpu.matmul %35, %37, %cst_24 {dimension_numbers = #tpu.dot_dimension_numbers<[1], [0], [0], [1], [0, 0, 1, 1], [], []>} : vector<256x4xbf16>, vector<4x128xbf16>, vector<256x128xf32> -> vector<256x128xf32>
    %39 = arith.addf %33, %38 : vector<256x128xf32>
    %40 = vector.extract_strided_slice %4 {offsets = [2, 0, 0], sizes = [16, 16, 4], strides = [1, 1, 1]} : vector<18x18x4xbf16> to vector<16x16x4xbf16>
    %41 = vector.shape_cast %40 : vector<16x16x4xbf16> to vector<256x4xbf16>
    %c6 = arith.constant 6 : index
    %c0_25 = arith.constant 0 : index
    %c0_26 = arith.constant 0 : index
    %42 = vector.load %arg4[%c6, %c0_25, %c0_26] : memref<9x4x128xbf16, #tpu.memory_space<vmem>>, vector<1x4x128xbf16>
    %43 = vector.shape_cast %42 : vector<1x4x128xbf16> to vector<4x128xbf16>
    %cst_27 = arith.constant dense<0.000000e+00> : vector<256x128xf32>
    %44 = tpu.matmul %41, %43, %cst_27 {dimension_numbers = #tpu.dot_dimension_numbers<[1], [0], [0], [1], [0, 0, 1, 1], [], []>} : vector<256x4xbf16>, vector<4x128xbf16>, vector<256x128xf32> -> vector<256x128xf32>
    %45 = arith.addf %39, %44 : vector<256x128xf32>
    %46 = vector.extract_strided_slice %4 {offsets = [2, 1, 0], sizes = [16, 16, 4], strides = [1, 1, 1]} : vector<18x18x4xbf16> to vector<16x16x4xbf16>
    %47 = vector.shape_cast %46 : vector<16x16x4xbf16> to vector<256x4xbf16>
    %c7 = arith.constant 7 : index
    %c0_28 = arith.constant 0 : index
    %c0_29 = arith.constant 0 : index
    %48 = vector.load %arg4[%c7, %c0_28, %c0_29] : memref<9x4x128xbf16, #tpu.memory_space<vmem>>, vector<1x4x128xbf16>
    %49 = vector.shape_cast %48 : vector<1x4x128xbf16> to vector<4x128xbf16>
    %cst_30 = arith.constant dense<0.000000e+00> : vector<256x128xf32>
    %50 = tpu.matmul %47, %49, %cst_30 {dimension_numbers = #tpu.dot_dimension_numbers<[1], [0], [0], [1], [0, 0, 1, 1], [], []>} : vector<256x4xbf16>, vector<4x128xbf16>, vector<256x128xf32> -> vector<256x128xf32>
    %51 = arith.addf %45, %50 : vector<256x128xf32>
    %52 = vector.extract_strided_slice %4 {offsets = [2, 2, 0], sizes = [16, 16, 4], strides = [1, 1, 1]} : vector<18x18x4xbf16> to vector<16x16x4xbf16>
    %53 = vector.shape_cast %52 : vector<16x16x4xbf16> to vector<256x4xbf16>
    %c8 = arith.constant 8 : index
    %c0_31 = arith.constant 0 : index
    %c0_32 = arith.constant 0 : index
    %54 = vector.load %arg4[%c8, %c0_31, %c0_32] : memref<9x4x128xbf16, #tpu.memory_space<vmem>>, vector<1x4x128xbf16>
    %55 = vector.shape_cast %54 : vector<1x4x128xbf16> to vector<4x128xbf16>
    %cst_33 = arith.constant dense<0.000000e+00> : vector<256x128xf32>
    %56 = tpu.matmul %53, %55, %cst_33 {dimension_numbers = #tpu.dot_dimension_numbers<[1], [0], [0], [1], [0, 0, 1, 1], [], []>} : vector<256x4xbf16>, vector<4x128xbf16>, vector<256x128xf32> -> vector<256x128xf32>
    %57 = arith.addf %51, %56 : vector<256x128xf32>
    %c0_34 = arith.constant 0 : index
    %c0_35 = arith.constant 0 : index
    %58 = vector.load %arg5[%c0_34, %c0_35] : memref<1x128xf32, #tpu.memory_space<vmem>>, vector<1x128xf32>
    %59 = vector.shape_cast %58 : vector<1x128xf32> to vector<128xf32>
    %60 = vector.shape_cast %59 : vector<128xf32> to vector<1x128xf32>
    %61 = vector.broadcast %60 : vector<1x128xf32> to vector<256x128xf32>
    %62 = arith.addf %57, %61 : vector<256x128xf32>
    %63 = arith.negf %62 : vector<256x128xf32>
    %64 = math.exp %63 : vector<256x128xf32>
    %cst_36 = arith.constant 1.000000e+00 : f32
    %65 = vector.broadcast %cst_36 : f32 to vector<256x128xf32>
    %66 = arith.addf %65, %64 : vector<256x128xf32>
    %67 = arith.divf %65, %66 : vector<256x128xf32>
    %68 = arith.mulf %62, %67 : vector<256x128xf32>
    %69 = arith.truncf %68 : vector<256x128xf32> to vector<256x128xbf16>
    %c0_37 = arith.constant 0 : index
    %c0_38 = arith.constant 0 : index
    %c0_39 = arith.constant 0 : index
    %c0_40 = arith.constant 0 : index
    %70 = vector.load %arg6[%c0_37, %c0_38, %c0_39, %c0_40] : memref<1x1x256x128xbf16, #tpu.memory_space<vmem>>, vector<1x1x256x128xbf16>
    %71 = vector.shape_cast %70 : vector<1x1x256x128xbf16> to vector<256x128xbf16>
    %72 = vector.shape_cast %69 : vector<256x128xbf16> to vector<1x1x256x128xbf16>
    tpu.vector_store %arg6[%c0_37, %c0_38, %c0_39, %c0_40], %72 {strides = array<i32>} : memref<1x1x256x128xbf16, #tpu.memory_space<vmem>>, vector<1x1x256x128xbf16>,
    return
  }
  func.func @transform_0(%arg0: i32, %arg1: i32) -> (i32, i32, i32, i32) {
    %c0_i32 = arith.constant 0 : i32
    %c0_i32_0 = arith.constant 0 : i32
    %c0_i32_1 = arith.constant 0 : i32
    return %arg0, %arg1, %c0_i32, %c0_i32_0 : i32, i32, i32, i32
  }
  func.func @transform_1(%arg0: i32, %arg1: i32) -> (i32, i32, i32, i32) {
    %c1_i32 = arith.constant 1 : i32
    %0 = arith.addi %arg1, %c1_i32 : i32
    %c8_i32 = arith.constant 8 : i32
    %1 = arith.muli %0, %c8_i32 : i32
    %c0_i32 = arith.constant 0 : i32
    %c0_i32_0 = arith.constant 0 : i32
    %c0_i32_1 = arith.constant 0 : i32
    return %arg0, %1, %c0_i32, %c0_i32_0 : i32, i32, i32, i32
  }
  func.func @transform_2(%arg0: i32, %arg1: i32) -> (i32, i32, i32) {
    %c0_i32 = arith.constant 0 : i32
    %c0_i32_0 = arith.constant 0 : i32
    %c0_i32_1 = arith.constant 0 : i32
    %c0_i32_2 = arith.constant 0 : i32
    return %c0_i32, %c0_i32_0, %c0_i32_1 : i32, i32, i32
  }
  func.func @transform_3(%arg0: i32, %arg1: i32) -> (i32, i32) {
    %c0_i32 = arith.constant 0 : i32
    %c0_i32_0 = arith.constant 0 : i32
    %c0_i32_1 = arith.constant 0 : i32
    return %c0_i32, %c0_i32_0 : i32, i32
  }
  func.func @transform_4(%arg0: i32, %arg1: i32) -> (i32, i32, i32, i32) {
    %c0_i32 = arith.constant 0 : i32
    %c0_i32_0 = arith.constant 0 : i32
    %c0_i32_1 = arith.constant 0 : i32
    return %arg0, %arg1, %c0_i32, %c0_i32_0 : i32, i32, i32, i32
  }
}

</mosaic_0001>

<bundles_post_ra>
// kernel: tpu_custom_call.1
= control target key start
LH: loop header
LB: loop body
LE: loop exit
PB: predicated region body
PF: predicated region fallthrough
CT: control target
= control target key end

     0   :  { %9 = vsyncpa [#allocation3], 0  ;;  %s6299_s0 = inlined_call_operand.vmem [shape: bf16[2,32,18,4], index: 0, kind: input, shape index: {}]   ;;  %s6300_s1 = inlined_call_operand.vmem [shape: bf16[2,32,18,4], index: 1, kind: input, shape index: {}]   ;;  %s6301_s2 = inlined_call_operand.vmem [shape: bf16[9,4,128], index: 2, kind: input, shape index: {}]   ;;  %s6302_s3 = inlined_call_operand.vmem [shape: f32[1,128], index: 3, kind: input, shape index: {}]   ;;  %s6303_s4 = inlined_call_operand.hbm [shape: bf16[2,1,256,128], index: 4, kind: output, shape index: {}]  }
   0x1   :  { %11 = vsyncpa [#allocation3 + $0x1], 0  ;;  %s5017_s15 = smov 0   ;;  %s5019_s16 = smov 0  }
   0x2   :  { %s5021_s17 = smov 0   ;;  %s5023_s18 = smov 0  }
   0x3   :  { %s5025_s19 = smov 0   ;;  %s5027_s20 = smov 0  }
   0x4 LB: > { %s3540_s21 = sadd.s32 4294967295, %s4987_s20   ;;  %s3541_s22 = sadd.s32 4294967294, %s4987_s20   ;;  %s4987_s20 = sphi %s5027_s20, %s17_s20   ;;  %s4983_s19 = sphi %s5025_s19, %s6387_s19   ;;  %s4979_s18 = sphi %s5023_s18, %s6386_s18   ;;  %s4975_s17 = sphi %s5021_s17, %s6385_s17   ;;  %s4971_s16 = sphi %s5019_s16, %s6384_s16   ;;  %s4967_s15 = sphi %s5017_s15, %s6383_s15  }
   0x5   : > { %s29_s23 = sadd.s32 1, %s4983_s19  ;;  %s140_s24 = sadd.s32 1, %s4975_s17 }
   0x6   : > { %p31_p0 = scmp.ge.s32.totalorder %s29_s23, 2  ;;  %p150_p1 = scmp.ne.s32.totalorder %s4975_s17, %s4971_s16 }
   0x7   : > { %p151_p2 = scmp.eq.s32.totalorder %s3540_s21, 1  ;;  %p156_p3 = scmp.ne.s32.totalorder %s4971_s16, %s4967_s15 }
   0x8   : > { %s6389_s23 = smov (%p31_p0, %s29_s23), 0  ;;  %p157_p5 = scmp.eq.s32.totalorder %s3541_s22, 1 }
   0x9   : > { %p5057_p4 = por %p151_p2, %p150_p1  ;;  %s135_s26 = ssub.s32 %s4983_s19, %s6389_s23 }
   0xa   : > { %p3544_p6 = scmp.ge.s32.totalorder %s4987_s20, 1  ;;  %p138_p7 = scmp.eq.s32.totalorder %s135_s26, 0 }
   0xb   : > { %p5064_p8 = por %p157_p5, %p156_p3  ;;  %p213_p9 = scmp.lt.s32.totalorder %s4987_s20, 3 }
   0xc   : > { %s5070_s28 = scalar_select %p138_p7, %s4975_s17, %s140_s24  }
   0xd   : > { %p214_p10 = pnand %p3544_p6, %p213_p9 }
   0xf   : > { %217 = sbr.rel (%p214_p10) target bundleno = 611 (0x263), region = 36 }
  0x16   : > { %v3548_v0 = vld [vmem:[%s6301_s2 + $0x2] sm:$0x3]  ;;  %vm824_vm0 = vcmask 1041408   ;;  %v3680_v1 = vld [vmem:[%s6301_s2 + $0x8] sm:$0x3]  ;;  %p257_p11 = scmp.lt.s32.totalorder %s4979_s18, 1 }
  0x17   : > { %4689 = vmatprep.subr.msk.bf16.mxu1 %vm824_vm0, %v3548_v0  ;;  %4693 = vmatprep.subr.msk.bf16.mxu0 %vm824_vm0, %v3680_v1  ;;  %v826_v2 = vsel %vm824_vm0, %v3548_v0, 0  ;;  %v5083_v3 = vsel %vm824_vm0, %v3680_v1, 0  ;;  %v337_v4 = vld [vmem:[%s6301_s2] sm:$0x3]  ;;  %v3699_v5 = vld [vmem:[%s6301_s2 + $0xa] sm:$0x3] }
  0x18   : > { %6337 = vst [vmem:[#allocation5_spill] sm:$0xff] %v5083_v3  ;;  %4126 = vmatpush3.bf16.msra.mxu1 %v826_v2  ;;  %4262 = vmatpush3.bf16.msra.mxu0 %v5083_v3  ;;  %s5087_s7 = scalar_select %p257_p11, %s4979_s18, 1  ;;  %vm338_vm1 = vsmask.f32 3328  ;;  %vm339_vm2 = vsmask.f32 7440 }
  0x19   : > { %4690 = vmatprep.subr.msk.bf16.mxu1 %vm824_vm0, %v337_v4  ;;  %4695 = vmatprep.subr.msk.bf16.mxu0 %vm824_vm0, %v3699_v5  ;;  %v5106_v6 = vsel %vm824_vm0, %v337_v4, 0  ;;  %v5109_v7 = vsel %vm824_vm0, %v3699_v5, 0  ;;  %v5114_v8 = vld [vmem:[%s6301_s2 + $0xc] sm:$0x3]  ;;  %vm775_vm3 = vcmask 31744   ;;  %vm5150_vm4 = vmor %vm338_vm1, %vm339_vm2  ;;  %vm1297_vm5 = vcmask 1042432  }
  0x1a   : > { %s4699_s12 = smul.u32 384, %s5087_s7  ;;  %v5138_v20 = vsel %vm824_vm0, %v5114_v8, 0  ;;  %vm1298_vm6 = vcmask 1046532   ;;  %s253_s26 = sand.u32 1, %s4971_s16  }
  0x1b   : > { %vm5331_vm7 = vmor %vm1297_vm5, %vm1298_vm6  ;;  %s6123_s29 = sshll.u32 %s253_s26, 7  ;;  %s3876_s5 = sshll.u32 %s4979_s18, 11 }
  0x1c   : > { %s5103_s21 = scalar_lea.vmem %s6299_s0, %s4699_s12  ;;  %s3843_s9 = sadd.s32 192, %s4699_s12 }
  0x1d   : > { %v5117_v9 = vld [vmem:[%s5103_s21] sm:$0xf]  ;;  %v5120_v10 = vld [vmem:[%s5103_s21 + $0x4] sm:$0xf]  ;;  %v285_v11 = vld [vmem:[%s5103_s21 + $0x8] sm:$0x1]  ;;  %s5699_s11 = scalar_lea.vmem %s6300_s1, %s3843_s9  ;;  %s6245_s7 = scalar_lea.hbm %s6303_s4, %s3876_s5 }
  0x1e   : > { %v342_v12 = vshrl.u32 %v5117_v9, 16  ;;  %v345_v13 = vshll.u32 %v5117_v9, 16  ;;  %v351_v14 = vshll.u32 %v5120_v10, 16  ;;  %v355_v15 = vshrl.u32 %v5120_v10, 16  ;;  %v5128_v16 = vld [vmem:[%s5103_s21 + $0xc] sm:$0xf] }
  0x1f   : > { %v361_v17 = vshll.u32 %v285_v11, 16  ;;  %v5131_v18 = vld [vmem:[%s5103_s21 + $0x10] sm:$0xf]  ;;  %v5134_v19 = vld [vmem:[%s5103_s21 + $0x14] sm:$0x1]  ;;  %v366_v26 = vshrl.u32 %v5128_v16, 16 }
  0x20   : > { %v344_v21 = vrot.slane %v342_v12, 4  ;;  %v347_v22 = vrot.slane %v345_v13, 5  ;;  %v353_v23 = vrot.slane %v351_v14, 5  ;;  %v357_v24 = vrot.slane %v355_v15, 4  ;;  %v5146_v33 = vld [vmem:[%s5103_s21 + $0x18] sm:$0xf] }
  0x21   : > { %v363_v25 = vrot.slane %v361_v17, 5  ;;  %v369_v27 = vshll.u32 %v5128_v16, 16  ;;  %v375_v28 = vshll.u32 %v5131_v18, 16  ;;  %v379_v31 = vshrl.u32 %v5131_v18, 16  ;;  %v5159_v39 = vld [vmem:[%s5103_s21 + $0x1c] sm:$0xf] }
  0x22   : > { %v348_v29 = vor.u32 %v347_v22, %v344_v21  ;;  %v358_v30 = vor.u32 %v357_v24, %v353_v23  ;;  %v385_v32 = vshll.u32 %v5134_v19, 16  ;;  %v368_v35 = vrot.slane %v366_v26, 4  ;;  %v5163_v46 = vld [vmem:[%s5103_s21 + $0x20] sm:$0x1]  ;;  %v5173_v57 = vld [vmem:[%s5103_s21 + $0x24] sm:$0xf] }
  0x23   : > { %v371_v36 = vrot.slane %v369_v27, 5  ;;  %v377_v37 = vrot.slane %v375_v28, 5  ;;  %v5156_v38 = vcombine.low %v5128_v16, %v5131_v18  ;;  %v381_v42 = vrot.slane %v379_v31, 4  ;;  %v5178_v62 = vld [vmem:[%s5103_s21 + $0x28] sm:$0xf]  ;;  %s6138_s30 = scalar_lea.vmem [#allocation2], %s6123_s29 }
  0x24   : > { %v349_v40 = vrot.slane %v348_v29, 4  ;;  %v359_v41 = vrot.slane %v358_v30, 4  ;;  %v387_v43 = vrot.slane %v385_v32, 5  ;;  %v1312_v45 = vrot.slane %v5134_v19, 5  ;;  %v5186_v4 = vld [vmem:[%s5103_s21 + $0x2c] sm:$0x1] }
  0x25   : > { %v372_v44 = vor.u32 %v371_v36, %v368_v35  ;;  %v390_v47 = vshrl.u32 %v5146_v33, 16  ;;  %v393_v48 = vshll.u32 %v5146_v33, 16  ;;  %v382_v51 = vor.u32 %v381_v42, %v377_v37  ;;  %v5192_v14 = vld [vmem:[%s5103_s21 + $0x30] sm:$0xf]  ;;  %v5204_v28 = vld [vmem:[%s5103_s21 + $0x34] sm:$0xf] }
  0x26   : > { %v354_v49 = vsel %vm5150_vm4, %v349_v40, %v353_v23  ;;  %v364_v50 = vsel %vm5150_vm4, %v359_v41, %v363_v25  ;;  %v399_v52 = vshll.u32 %v5159_v39, 16  ;;  %v403_v60 = vshrl.u32 %v5159_v39, 16  ;;  %v5199_v23 = vld [vmem:[%s6301_s2 + $0x4] sm:$0x3]  ;;  %v5211_v32 = vld [vmem:[%s5103_s21 + $0x38] sm:$0x1] }
  0x27   : > { %v3549_v53 = vcombine.low %v354_v49, %v364_v50  ;;  %v373_v54 = vrot.slane %v372_v44, 4  ;;  %v392_v55 = vrot.slane %v390_v47, 4  ;;  %v395_v56 = vrot.slane %v393_v48, 5  ;;  %v5219_v48 = vld [vmem:[%s5103_s21 + $0x3c] sm:$0xf]  ;;  %s3437_s6 = sshll.u32 %s6138_s30, 4  ;;  %s6247_s6 = int_to_ptr.vmem [resolvable:$true] %s3437_s6 }
  0x28   : > { %v383_v58 = vrot.slane %v382_v51, 4  ;;  %v401_v59 = vrot.slane %v399_v52, 5  ;;  %v409_v61 = vshll.u32 %v5163_v46, 16  ;;  %v1316_v1 = vrot.slane %v5159_v39, 5  ;;  %v5227_v52 = vld [vmem:[%s5103_s21 + $0x40] sm:$0xf] }
  0x29   : > { %4127 = vmatprep.mubr.msk.bf16.mxu1 %vm775_vm3, %v3549_v53  ;;  %v378_v63 = vsel %vm5150_vm4, %v373_v54, %v377_v37  ;;  %v396_v0 = vor.u32 %v395_v56, %v392_v55  ;;  %v1319_v2 = vrot.slane %v5163_v46, 5  ;;  %v405_v11 = vrot.slane %v403_v60, 4  ;;  %s6253_s18 = scalar_lea.sflag [#allocation3], %s253_s26  ;;  %s4909_s10 = scalar_lea.vmem %s6247_s6, 2048 }
  0x2a   : > { %v388_v5 = vsel %vm5150_vm4, %v383_v58, %v387_v43  ;;  %v411_v12 = vrot.slane %v409_v61, 5  ;;  %v414_v13 = vshrl.u32 %v5173_v57, 16  ;;  %v417_v21 = vshll.u32 %v5173_v57, 16  ;;  %p4910_p12 = scmp.ne.s32.totalorder %s6247_s6, %s4909_s10 }
  0x2b   : > { %v3550_v15 = vcombine.low %v378_v63, %v388_v5  ;;  %v397_v17 = vrot.slane %v396_v0, 4  ;;  %v423_v22 = vshll.u32 %v5178_v62, 16  ;;  %v406_v24 = vor.u32 %v405_v11, %v401_v59  ;;  %v5239_v5 = vld [vmem:[%s5103_s21 + $0x44] sm:$0x1] }
  0x2c   : > { %v416_v25 = vrot.slane %v414_v13, 4  ;;  %v427_v26 = vshrl.u32 %v5178_v62, 16  ;;  %v433_v27 = vshll.u32 %v5186_v4, 16  ;;  %v419_v30 = vrot.slane %v417_v21, 5  ;;  %v5244_v13 = vld [vmem:[%s5103_s21 + $0x48] sm:$0xf]  ;;  %p4911_p13 = pnand %p4910_p12, %p5057_p4 }
  0x2d   : > { %4263 = vmatprep.mubr.msk.bf16.mxu0 %vm775_vm3, %v3550_v15  ;;  %4128 = vmatmul.mubr.msk.bf16.vlgmr.msra.gmra.mrb[0].mxu1 %vm775_vm3, %v3550_v15  ;;  %v402_v29 = vsel %vm5150_vm4, %v397_v17, %v401_v59  ;;  %v425_v31 = vrot.slane %v423_v22, 5  ;;  %v438_v35 = vshrl.u32 %v5192_v14, 16  ;;  %v407_v36 = vrot.slane %v406_v24, 4  ;;  %v5251_v24 = vld [vmem:[%s5103_s21 + $0x4c] sm:$0xf] }
  0x2e   : > { %4160 = vmatpush3.bf16.msra.mxu1 %v5106_v6  ;;  %v429_v37 = vrot.slane %v427_v26, 4  ;;  %v435_v40 = vrot.slane %v433_v27, 5  ;;  %v441_v41 = vshll.u32 %v5192_v14, 16  ;;  %v420_v42 = vor.u32 %v419_v30, %v416_v25  ;;  %p4912_p0 = pneg %p4911_p13 }
  0x2f   : > { %v440_v43 = vrot.slane %v438_v35, 4  ;;  %v447_v44 = vshll.u32 %v5204_v28, 16  ;;  %v451_v47 = vshrl.u32 %v5204_v28, 16  ;;  %4691 = vmatprep.subr.msk.bf16.mxu1 %vm824_vm0, %v5199_v23  ;;  %v412_v49 = vsel %vm5150_vm4, %v407_v36, %v411_v12 }
  0x30   : > { %v430_v6 = vor.u32 %v429_v37, %v425_v31  ;;  %v443_v50 = vrot.slane %v441_v41, 5  ;;  %v457_v51 = vshll.u32 %v5211_v32, 16  ;;  %v5229_v53 = vcombine.low %v402_v29, %v412_v49 }
  0x31   : > { %v421_v54 = vrot.slane %v420_v42, 4  ;;  %v449_v55 = vrot.slane %v447_v44, 5  ;;  %v453_v56 = vrot.slane %v451_v47, 4  ;;  %v462_v61 = vshrl.u32 %v5219_v48, 16  ;;  %v5273_v42 = vld [vmem:[%s5103_s21 + $0x54] sm:$0xf] }
  0x32   : > { %6340 = vst [vmem:[#allocation6_spill] sm:$0xff] %v5229_v53  ;;  %v431_v58 = vrot.slane %v430_v6, 4  ;;  %v444_v59 = vor.u32 %v443_v50, %v440_v43  ;;  %v459_v60 = vrot.slane %v457_v51, 5  ;;  %4264 = vmatmul.mubr.msk.bf16.vlgmr.msra.gmra.mrb[0].mxu0 %vm775_vm3, %v5229_v53  ;;  %4131 = vmatprep.mubr.msk.bf16.mxu1 %vm775_vm3, %v5229_v53  ;;  %v465_v11 = vshll.u32 %v5219_v48, 16  ;;  %6342 = vst [vmem:[#allocation8_spill] sm:$0xff] %v5273_v42 }
  0x33   : > { %v426_v63 = vsel %vm5150_vm4, %v421_v54, %v425_v31  ;;  %v454_v0 = vor.u32 %v453_v56, %v449_v55  ;;  %v471_v12 = vshll.u32 %v5227_v52, 16  ;;  %4296 = vmatpush3.bf16.msra.mxu0 %v5109_v7  ;;  %v464_v21 = vrot.slane %v462_v61, 4  ;;  %v5278_v6 = vld [vmem:[%s5103_s21 + $0x58] sm:$0xf] }
  0x34   : > { %v436_v15 = vsel %vm5150_vm4, %v431_v58, %v435_v40  ;;  %v445_v17 = vrot.slane %v444_v59, 4  ;;  %v475_v22 = vshrl.u32 %v5227_v52, 16  ;;  %v467_v27 = vrot.slane %v465_v11, 5  ;;  %4696 = vmatprep.subr.msk.bf16.mxu0 %vm824_vm0, %v5114_v8  ;;  %v5268_v8 = vld [vmem:[%s5103_s21 + $0x50] sm:$0x1] }
  0x35   : > { %v5253_v25 = vcombine.low %v426_v63, %v436_v15  ;;  %v455_v26 = vrot.slane %v454_v0, 4  ;;  %v473_v29 = vrot.slane %v471_v12, 5  ;;  %v481_v31 = vshll.u32 %v5239_v5, 16  ;;  %v5291_v11 = vld [vmem:[%s5103_s21 + $0x5c] sm:$0x1] }
  0x36   : > { %v450_v7 = vsel %vm5150_vm4, %v445_v17, %v449_v55  ;;  %v477_v30 = vrot.slane %v475_v22, 4  ;;  %v486_v35 = vshrl.u32 %v5244_v13, 16  ;;  %v468_v37 = vor.u32 %v467_v27, %v464_v21  ;;  %v5295_v15 = vld [vmem:[%s5103_s21 + $0x60] sm:$0xf]  ;;  %v5300_v27 = vld [vmem:[%s5103_s21 + $0x64] sm:$0xf] }
  0x37   : > { %6341 = vst [vmem:[#allocation7_spill] sm:$0xff] %v5253_v25  ;;  %4267 = vmatprep.mubr.msk.bf16.mxu0 %vm775_vm3, %v5253_v25  ;;  %4132 = vmatmul.mubr.msk.bf16.gmra.mrb[4].mxu1 %vm775_vm3, %v5253_v25  ;;  %v460_v36 = vsel %vm5150_vm4, %v455_v26, %v459_v60  ;;  %v489_v40 = vshll.u32 %v5244_v13, 16  ;;  %v495_v41 = vshll.u32 %v5251_v24, 16  ;;  %v483_v47 = vrot.slane %v481_v31, 5  ;;  %v5512_v25 = vld [vmem:[%s5103_s21 + $0xa8] sm:$0xf] }
  0x38   : > { %v5275_v43 = vcombine.low %v450_v7, %v460_v36  ;;  %v478_v44 = vor.u32 %v477_v30, %v473_v29  ;;  %v488_v49 = vrot.slane %v486_v35, 4  ;;  %v469_v50 = vrot.slane %v468_v37, 4 }
  0x39   : > { %v491_v51 = vrot.slane %v489_v40, 5  ;;  %v497_v54 = vrot.slane %v495_v41, 5  ;;  %v499_v55 = vshrl.u32 %v5251_v24, 16  ;;  %v505_v58 = vshll.u32 %v5268_v8, 16 }
  0x3a   : > { %6343 = vst [vmem:[#allocation9_spill] sm:$0xff] %v5275_v43  ;;  %4135 = vmatprep.mubr.msk.bf16.mxu1 %vm775_vm3, %v5275_v43  ;;  %v479_v56 = vrot.slane %v478_v44, 4  ;;  %v510_v59 = vshrl.u32 %v5273_v42, 16  ;;  %v513_v60 = vshll.u32 %v5273_v42, 16  ;;  %4268 = vmatmul.mubr.msk.bf16.gmra.mrb[4].mxu0 %vm775_vm3, %v5275_v43  ;;  %v474_v61 = vsel %vm5150_vm4, %v469_v50, %v473_v29 }
  0x3b   : > { %v492_v63 = vor.u32 %v491_v51, %v488_v49  ;;  %v501_v0 = vrot.slane %v499_v55, 4  ;;  %v519_v12 = vshll.u32 %v5278_v6, 16  ;;  %v507_v21 = vrot.slane %v505_v58, 5 }
  0x3c   : > { %v484_v17 = vsel %vm5150_vm4, %v479_v56, %v483_v47  ;;  %v512_v22 = vrot.slane %v510_v59, 4  ;;  %v515_v26 = vrot.slane %v513_v60, 5  ;;  %v523_v36 = vshrl.u32 %v5278_v6, 16  ;;  %v5314_v47 = vld [vmem:[%s5103_s21 + $0x68] sm:$0x1] }
  0x3d   : > { %v5302_v7 = vcombine.low %v474_v61, %v484_v17  ;;  %v493_v29 = vrot.slane %v492_v63, 4  ;;  %v502_v30 = vor.u32 %v501_v0, %v497_v54  ;;  %v521_v31 = vrot.slane %v519_v12, 5 }
  0x3e   : > { %v516_v35 = vor.u32 %v515_v26, %v512_v22  ;;  %v529_v37 = vshll.u32 %v5291_v11, 16  ;;  %v534_v40 = vshrl.u32 %v5295_v15, 16  ;;  %v537_v49 = vshll.u32 %v5295_v15, 16 }
  0x3f   : > { %6344 = vst [vmem:[#allocation10_spill] sm:$0xff] %v5302_v7  ;;  %4271 = vmatprep.mubr.msk.bf16.mxu0 %vm775_vm3, %v5302_v7  ;;  %4136 = vmatmul.mubr.msk.bf16.gmra.mrb[8].mxu1 %vm775_vm3, %v5302_v7  ;;  %v498_v41 = vsel %vm5150_vm4, %v493_v29, %v497_v54  ;;  %v503_v44 = vrot.slane %v502_v30, 4  ;;  %v543_v50 = vshll.u32 %v5300_v27, 16  ;;  %v525_v55 = vrot.slane %v523_v36, 4  ;;  %v5322_v54 = vld [vmem:[%s5103_s21 + $0x6c] sm:$0xf] }
  0x40   : > { %v517_v51 = vrot.slane %v516_v35, 4  ;;  %v531_v56 = vrot.slane %v529_v37, 5  ;;  %v536_v58 = vrot.slane %v534_v40, 4  ;;  %v539_v60 = vrot.slane %v537_v49, 5  ;;  %v5338_v36 = vld [vmem:[%s5103_s21 + $0x70] sm:$0xf] }
  0x41   : > { %v508_v59 = vsel %vm5150_vm4, %v503_v44, %v507_v21  ;;  %v545_v61 = vrot.slane %v543_v50, 5  ;;  %v547_v63 = vshrl.u32 %v5300_v27, 16  ;;  %v526_v17 = vor.u32 %v525_v55, %v521_v31  ;;  %v5489_v7 = vld [vmem:[%s5103_s21 + $0xa0] sm:$0xf] }
  0x42   : > { %v5324_v0 = vcombine.low %v498_v41, %v508_v59  ;;  %v522_v12 = vsel %vm5150_vm4, %v517_v51, %v521_v31  ;;  %v553_v22 = vshll.u32 %v5314_v47, 16  ;;  %v540_v21 = vor.u32 %v539_v60, %v536_v58  ;;  %v5351_v51 = vld [vmem:[%s5103_s21 + $0x74] sm:$0x1] }
  0x43   : > { %v549_v29 = vrot.slane %v547_v63, 4  ;;  %v3614_v30 = vrot.slane %v5128_v16, 9  ;;  %v1309_v35 = vrot.slane %v5131_v18, 5  ;;  %v527_v31 = vrot.slane %v526_v17, 4 }
  0x44   : > { %6345 = vst [vmem:[#allocation11_spill] sm:$0xff] %v5324_v0  ;;  %4272 = vmatmul.mubr.msk.bf16.gmra.mrb[8].mxu0 %vm775_vm3, %v5324_v0  ;;  %4139 = vmatprep.mubr.msk.bf16.mxu1 %vm775_vm3, %v5324_v0  ;;  %v555_v37 = vrot.slane %v553_v22, 5  ;;  %v558_v40 = vshrl.u32 %v5322_v54, 16  ;;  %v561_v41 = vshll.u32 %v5322_v54, 16  ;;  %v541_v44 = vrot.slane %v540_v21, 4 }
  0x45   : > { %v550_v49 = vor.u32 %v549_v29, %v545_v61  ;;  %v1310_v16 = vsel %vm5331_vm7, %v3614_v30, %v1309_v35  ;;  %v1311_v18 = vrot.slane %v1309_v35, 4  ;;  %v532_v50 = vsel %vm5150_vm4, %v527_v31, %v531_v56  ;;  %v5363_v56 = vld [vmem:[%s5103_s21 + $0x78] sm:$0xf]  ;;  %v5379_v31 = vld [vmem:[%s5103_s21 + $0x7c] sm:$0xf] }
  0x46   : > { %v560_v55 = vrot.slane %v558_v40, 4  ;;  %v563_v58 = vrot.slane %v561_v41, 5  ;;  %v567_v59 = vshll.u32 %v5338_v36, 16  ;;  %v5354_v60 = vcombine.low %v522_v12, %v532_v50 }
  0x47   : > { %v546_v63 = vsel %vm5150_vm4, %v541_v44, %v545_v61  ;;  %v551_v17 = vrot.slane %v550_v49, 4  ;;  %v1313_v22 = vsel %vm5331_vm7, %v1311_v18, %v1312_v45  ;;  %v571_v35 = vshrl.u32 %v5338_v36, 16  ;;  %v5384_v49 = vld [vmem:[%s5103_s21 + $0x80] sm:$0x1] }
  0x48   : > { %6348 = vst [vmem:[#allocation12_spill] sm:$0xff] %v5354_v60  ;;  %v5365_v21 = vcombine.low %v1310_v16, %v1313_v22  ;;  %v564_v29 = vor.u32 %v563_v58, %v560_v55  ;;  %v569_v30 = vrot.slane %v567_v59, 5  ;;  %4275 = vmatprep.mubr.msk.bf16.mxu0 %vm775_vm3, %v5354_v60  ;;  %4140 = vmatmul.mubr.msk.bf16.gmra.mrb[12].mxu1 %vm775_vm3, %v5354_v60  ;;  %v577_v45 = vshll.u32 %v5351_v51, 16  ;;  %v5482_v60 = vld [vmem:[%s5103_s21 + $0x9c] sm:$0xf] }
  0x49   : > { %v556_v19 = vsel %vm5150_vm4, %v551_v17, %v555_v37  ;;  %v3615_v61 = vrot.slane %v5146_v33, 9  ;;  %v1318_v12 = vrot.slane %v1316_v1, 4  ;;  %v573_v44 = vrot.slane %v571_v35, 4 }
  0x4a   : > { %6349 = vst [vmem:[#allocation13_spill] sm:$0xff] %v5365_v21  ;;  %v5381_v40 = vcombine.low %v546_v63, %v556_v19  ;;  %v565_v41 = vrot.slane %v564_v29, 4  ;;  %v582_v16 = vshrl.u32 %v5363_v56, 16  ;;  %v579_v18 = vrot.slane %v577_v45, 5  ;;  %v5410_v29 = vld [vmem:[%s5103_s21 + $0x84] sm:$0xf] }
  0x4b   : > { %v1317_v37 = vsel %vm5331_vm7, %v3615_v61, %v1316_v1  ;;  %v1320_v50 = vsel %vm5331_vm7, %v1318_v12, %v1319_v2  ;;  %v585_v55 = vshll.u32 %v5363_v56, 16  ;;  %v574_v59 = vor.u32 %v573_v44, %v569_v30 }
  0x4c   : > { %6350 = vst [vmem:[#allocation14_spill] sm:$0xff] %v5381_v40  ;;  %4276 = vmatmul.mubr.msk.bf16.gmra.mrb[12].mxu0 %vm775_vm3, %v5381_v40  ;;  %4143 = vmatprep.mubr.msk.bf16.mxu1 %vm775_vm3, %v5381_v40  ;;  %v570_v58 = vsel %vm5150_vm4, %v565_v41, %v569_v30  ;;  %v5402_v63 = vcombine.low %v1317_v37, %v1320_v50  ;;  %v584_v1 = vrot.slane %v582_v16, 4  ;;  %v591_v2 = vshll.u32 %v5379_v31, 16  ;;  %v5416_v16 = vld [vmem:[%s5103_s21 + $0x88] sm:$0xf] }
  0x4d   : > { %4297 = vmatprep.mubr.msk.bf16.mxu0 %vm775_vm3, %v5365_v21  ;;  %v587_v46 = vrot.slane %v585_v55, 5  ;;  %v595_v17 = vshrl.u32 %v5379_v31, 16  ;;  %v601_v22 = vshll.u32 %v5384_v49, 16  ;;  %v575_v35 = vrot.slane %v574_v59, 4 }
  0x4e   : > { %6351 = vst [vmem:[#allocation15_spill] sm:$0xff] %v5402_v63  ;;  %v3616_v30 = vrot.slane %v5173_v57, 9  ;;  %v1323_v19 = vrot.slane %v5178_v62, 5  ;;  %v1326_v45 = vrot.slane %v5186_v4, 5  ;;  %v593_v12 = vrot.slane %v591_v2, 5 }
  0x4f   : > { %v588_v61 = vor.u32 %v587_v46, %v584_v1  ;;  %v597_v41 = vrot.slane %v595_v17, 4  ;;  %v603_v44 = vrot.slane %v601_v22, 5  ;;  %v580_v37 = vsel %vm5150_vm4, %v575_v35, %v579_v18  ;;  %v5426_v1 = vld [vmem:[%s5103_s21 + $0x8c] sm:$0x1] }
  0x50   : > { %v1324_v50 = vsel %vm5331_vm7, %v3616_v30, %v1323_v19  ;;  %v1325_v55 = vrot.slane %v1323_v19, 4  ;;  %v606_v59 = vshrl.u32 %v5410_v29, 16  ;;  %v5423_v3 = vcombine.low %v570_v58, %v580_v37 }
  0x51   : > { %v589_v40 = vrot.slane %v588_v61, 4  ;;  %v598_v4 = vor.u32 %v597_v41, %v593_v12  ;;  %v609_v46 = vshll.u32 %v5410_v29, 16  ;;  %v615_v18 = vshll.u32 %v5416_v16, 16  ;;  %v5440_v61 = vld [vmem:[%s5103_s21 + $0x90] sm:$0xf] }
  0x52   : > { %6352 = vst [vmem:[#allocation16_spill] sm:$0xff] %v5423_v3  ;;  %v1327_v2 = vsel %vm5331_vm7, %v1325_v55, %v1326_v45  ;;  %v608_v17 = vrot.slane %v606_v59, 4  ;;  %v619_v22 = vshrl.u32 %v5416_v16, 16  ;;  %4144 = vmatmul.mubr.msk.bf16.gmra.mrb[16].mxu1 %vm775_vm3, %v5423_v3  ;;  %v5445_v45 = vld [vmem:[%s6301_s2 + $0xe] sm:$0x3]  ;;  %v1330_v59 = vrot.slane %v5204_v28, 5 }
  0x53   : > { %v594_v58 = vsel %vm5150_vm4, %v589_v40, %v593_v12  ;;  %v599_v35 = vrot.slane %v598_v4, 4  ;;  %v5437_v30 = vcombine.low %v1324_v50, %v1327_v2  ;;  %v611_v19 = vrot.slane %v609_v46, 5  ;;  %6354 = vst [vmem:[#allocation18_spill] sm:$0xff] %v5445_v45  ;;  %v5459_v46 = vld [vmem:[%s5103_s21 + $0x94] sm:$0xf] }
  0x54   : > { %4298 = vmatmul.mubr.msk.bf16.vlgmr.msra.gmra.mrb[0].mxu0 %vm775_vm3, %v5402_v63  ;;  %v617_v41 = vrot.slane %v615_v18, 5  ;;  %v621_v37 = vrot.slane %v619_v22, 4  ;;  %v625_v40 = vshll.u32 %v5426_v1, 16  ;;  %v3617_v12 = vrot.slane %v5192_v14, 9  ;;  %v5464_v3 = vld [vmem:[%s5103_s21 + $0x98] sm:$0x1] }
  0x55   : > { %6353 = vst [vmem:[#allocation17_spill] sm:$0xff] %v5437_v30  ;;  %4330 = vmatpush3.bf16.msra.mxu0 %v5138_v20  ;;  %v604_v50 = vsel %vm5150_vm4, %v599_v35, %v603_v44  ;;  %4301 = vmatprep.mubr.msk.bf16.mxu0 %vm775_vm3, %v5437_v30  ;;  %v612_v55 = vor.u32 %v611_v19, %v608_v17  ;;  %v1333_v4 = vrot.slane %v5211_v32, 5  ;;  %v630_v20 = vshrl.u32 %v5440_v61, 16 }
  0x56   : > { %v5461_v2 = vcombine.low %v594_v58, %v604_v50  ;;  %v622_v18 = vor.u32 %v621_v37, %v617_v41  ;;  %v627_v22 = vrot.slane %v625_v40, 5  ;;  %4697 = vmatprep.subr.msk.bf16.mxu0 %vm824_vm0, %v5445_v45  ;;  %v1331_v17 = vsel %vm5331_vm7, %v3617_v12, %v1330_v59 }
  0x57   : > { %v613_v44 = vrot.slane %v612_v55, 4  ;;  %v1332_v35 = vrot.slane %v1330_v59, 4  ;;  %v633_v32 = vshll.u32 %v5440_v61, 16  ;;  %v632_v19 = vrot.slane %v630_v20, 4 }
  0x58   : > { %6355 = vst [vmem:[#allocation19_spill] sm:$0xff] %v5461_v2  ;;  %4147 = vmatprep.mubr.msk.bf16.mxu1 %vm775_vm3, %v5461_v2  ;;  %v623_v58 = vrot.slane %v622_v18, 4  ;;  %v639_v37 = vshll.u32 %v5459_v46, 16  ;;  %v643_v40 = vshrl.u32 %v5459_v46, 16  ;;  %v649_v59 = vshll.u32 %v5464_v3, 16 }
  0x59   : > { %v618_v50 = vsel %vm5150_vm4, %v613_v44, %v617_v41  ;;  %v1334_v55 = vsel %vm5331_vm7, %v1332_v35, %v1333_v4  ;;  %v635_v12 = vrot.slane %v633_v32, 5  ;;  %v3618_v4 = vrot.slane %v5219_v48, 9 }
  0x5a   : > { %v628_v2 = vsel %vm5150_vm4, %v623_v58, %v627_v22  ;;  %v5486_v18 = vcombine.low %v1331_v17, %v1334_v55  ;;  %v641_v20 = vrot.slane %v639_v37, 5  ;;  %v645_v0 = vrot.slane %v643_v40, 4  ;;  %v5502_v58 = vld [vmem:[%s5103_s21 + $0xa4] sm:$0x1] }
  0x5b   : > { %v5491_v43 = vcombine.low %v618_v50, %v628_v2  ;;  %v636_v41 = vor.u32 %v635_v12, %v632_v19  ;;  %v651_v44 = vrot.slane %v649_v59, 5  ;;  %v1337_v32 = vrot.slane %v5227_v52, 5 }
  0x5c   : > { %6356 = vst [vmem:[#allocation20_spill] sm:$0xff] %v5486_v18  ;;  %4302 = vmatmul.mubr.msk.bf16.gmra.mrb[4].mxu0 %vm775_vm3, %v5486_v18  ;;  %v646_v35 = vor.u32 %v645_v0, %v641_v20  ;;  %v1340_v22 = vrot.slane %v5239_v5, 5  ;;  %v654_v17 = vshrl.u32 %v5482_v60, 16  ;;  %v657_v19 = vshll.u32 %v5482_v60, 16 }
  0x5d   : > { %6357 = vst [vmem:[#allocation21_spill] sm:$0xff] %v5491_v43  ;;  %4148 = vmatmul.mubr.msk.bf16.gmra.mrb[20].mxu1 %vm775_vm3, %v5491_v43  ;;  %v637_v2 = vrot.slane %v636_v41, 4  ;;  %v663_v37 = vshll.u32 %v5489_v7, 16  ;;  %v667_v0 = vshrl.u32 %v5489_v7, 16  ;;  %v1338_v5 = vsel %vm5331_vm7, %v3618_v4, %v1337_v32 }
  0x5e   : > { %v647_v40 = vrot.slane %v646_v35, 4  ;;  %v1339_v50 = vrot.slane %v1337_v32, 4  ;;  %v656_v55 = vrot.slane %v654_v17, 4  ;;  %v659_v59 = vrot.slane %v657_v19, 5  ;;  %v5521_v32 = vld [vmem:[%s5103_s21 + $0xac] sm:$0xf] }
  0x5f   : > { %v642_v12 = vsel %vm5150_vm4, %v637_v2, %v641_v20  ;;  %v665_v41 = vrot.slane %v663_v37, 5  ;;  %v669_v43 = vrot.slane %v667_v0, 4  ;;  %v673_v35 = vshll.u32 %v5502_v58, 16 }
  0x60   : > { %v652_v53 = vsel %vm5150_vm4, %v647_v40, %v651_v44  ;;  %v1341_v18 = vsel %vm5331_vm7, %v1339_v50, %v1340_v22  ;;  %v3619_v4 = vrot.slane %v5244_v13, 9  ;;  %v660_v2 = vor.u32 %v659_v59, %v656_v55 }
  0x61   : > { %v5523_v17 = vcombine.low %v642_v12, %v652_v53  ;;  %v5525_v20 = vcombine.low %v1338_v5, %v1341_v18  ;;  %v670_v19 = vor.u32 %v669_v43, %v665_v41  ;;  %v675_v37 = vrot.slane %v673_v35, 5  ;;  %v5535_v18 = vld [vmem:[%s5103_s21 + $0xb0] sm:$0x1] }
  0x62   : > { %v1344_v0 = vrot.slane %v5251_v24, 5  ;;  %v1347_v44 = vrot.slane %v5268_v8, 5  ;;  %v678_v22 = vshrl.u32 %v5512_v25, 16  ;;  %v661_v53 = vrot.slane %v660_v2, 4 }
  0x63   : > { %6358 = vst [vmem:[#allocation22_spill] sm:$0xff] %v5523_v17  ;;  %6359 = vst [vmem:[#allocation23_spill] sm:$0xff] %v5525_v20  ;;  %4151 = vmatprep.mubr.msk.bf16.mxu1 %vm775_vm3, %v5523_v17  ;;  %4305 = vmatprep.mubr.msk.bf16.mxu0 %vm775_vm3, %v5525_v20  ;;  %v671_v40 = vrot.slane %v670_v19, 4  ;;  %v681_v43 = vshll.u32 %v5512_v25, 16  ;;  %v687_v5 = vshll.u32 %v5521_v32, 16  ;;  %v691_v12 = vshrl.u32 %v5521_v32, 16 }
  0x64   : > { %v1345_v8 = vsel %vm5331_vm7, %v3619_v4, %v1344_v0  ;;  %v1346_v50 = vrot.slane %v1344_v0, 4  ;;  %v680_v55 = vrot.slane %v678_v22, 4  ;;  %v666_v59 = vsel %vm5150_vm4, %v661_v53, %v665_v41  ;;  %v5547_v17 = vld [vmem:[%s5103_s21 + $0xb4] sm:$0xf]  ;;  %v5559_v53 = vld [vmem:[%s5103_s21 + $0xb8] sm:$0xf] }
  0x65   : > { %v676_v35 = vsel %vm5150_vm4, %v671_v40, %v675_v37  ;;  %v683_v2 = vrot.slane %v681_v43, 5  ;;  %v689_v19 = vrot.slane %v687_v5, 5  ;;  %v693_v0 = vrot.slane %v691_v12, 4 }
  0x66   : > { %v5549_v20 = vcombine.low %v666_v59, %v676_v35  ;;  %v1348_v4 = vsel %vm5331_vm7, %v1346_v50, %v1347_v44  ;;  %v697_v22 = vshll.u32 %v5535_v18, 16  ;;  %v3620_v41 = vrot.slane %v5273_v42, 9  ;;  %v5565_v44 = vld [vmem:[%s5103_s21 + $0xbc] sm:$0x1] }
  0x67   : > { %v5554_v30 = vcombine.low %v1345_v8, %v1348_v4  ;;  %v684_v63 = vor.u32 %v683_v2, %v680_v55  ;;  %v1351_v37 = vrot.slane %v5278_v6, 5  ;;  %v694_v40 = vor.u32 %v693_v0, %v689_v19 }
  0x68   : > { %6360 = vst [vmem:[#allocation24_spill] sm:$0xff] %v5549_v20  ;;  %4152 = vmatmul.mubr.msk.bf16.gmra.mrb[24].mxu1 %vm775_vm3, %v5549_v20  ;;  %v699_v43 = vrot.slane %v697_v22, 5  ;;  %v1354_v5 = vrot.slane %v5291_v11, 5  ;;  %v702_v50 = vshrl.u32 %v5547_v17, 16  ;;  %v705_v59 = vshll.u32 %v5547_v17, 16 }
  0x69   : > { %6361 = vst [vmem:[#allocation25_spill] sm:$0xff] %v5554_v30  ;;  %4306 = vmatmul.mubr.msk.bf16.gmra.mrb[8].mxu0 %vm775_vm3, %v5554_v30  ;;  %v685_v8 = vrot.slane %v684_v63, 4  ;;  %v1352_v55 = vsel %vm5331_vm7, %v3620_v41, %v1351_v37  ;;  %v1353_v12 = vrot.slane %v1351_v37, 4  ;;  %v695_v35 = vrot.slane %v694_v40, 4 }
  0x6a   : > { %v704_v2 = vrot.slane %v702_v50, 4  ;;  %v711_v4 = vshll.u32 %v5559_v53, 16  ;;  %v715_v11 = vshrl.u32 %v5559_v53, 16  ;;  %v707_v20 = vrot.slane %v705_v59, 5 }
  0x6b   : > { %v690_v0 = vsel %vm5150_vm4, %v685_v8, %v689_v19  ;;  %v1355_v22 = vsel %vm5331_vm7, %v1353_v12, %v1354_v5  ;;  %v721_v63 = vshll.u32 %v5565_v44, 16  ;;  %v700_v41 = vsel %vm5150_vm4, %v695_v35, %v699_v43 }
  0x6c   : > { %v5582_v37 = vcombine.low %v1352_v55, %v1355_v22  ;;  %v713_v40 = vrot.slane %v711_v4, 5  ;;  %v717_v50 = vrot.slane %v715_v11, 4  ;;  %v5584_v30 = vcombine.low %v690_v0, %v700_v41 }
  0x6d   : > { %v708_v21 = vor.u32 %v707_v20, %v704_v2  ;;  %v723_v45 = vrot.slane %v721_v63, 5  ;;  %v3621_v42 = vrot.slane %v5295_v15, 9  ;;  %v1358_v5 = vrot.slane %v5300_v27, 5 }
  0x6e   : > { %4309 = vmatprep.mubr.msk.bf16.mxu0 %vm775_vm3, %v5582_v37  ;;  %v718_v19 = vor.u32 %v717_v50, %v713_v40  ;;  %v1361_v8 = vrot.slane %v5314_v47, 5  ;;  %v3622_v43 = vrot.slane %v5322_v54, 9  ;;  %4155 = vmatprep.mubr.msk.bf16.mxu1 %vm775_vm3, %v5584_v30  ;;  %v3581_v20 = vcombine.low %v5117_v9, %v5120_v10 }
  0x6f   : > { %v709_v55 = vrot.slane %v708_v21, 4  ;;  %v1365_v12 = vrot.slane %v5338_v36, 5  ;;  %v1368_v59 = vrot.slane %v5351_v51, 5  ;;  %v1359_v2 = vsel %vm5331_vm7, %v3621_v42, %v1358_v5 }
  0x70   : > { %v719_v35 = vrot.slane %v718_v19, 4  ;;  %v1360_v4 = vrot.slane %v1358_v5, 4  ;;  %v1372_v47 = vrot.slane %v5379_v31, 5  ;;  %v3623_v9 = vrot.slane %v5363_v56, 9 }
  0x71   : > { %v714_v11 = vsel %vm5150_vm4, %v709_v55, %v713_v40  ;;  %v1366_v21 = vsel %vm5331_vm7, %v3622_v43, %v1365_v12  ;;  %v1367_v0 = vrot.slane %v1365_v12, 4  ;;  %v1375_v42 = vrot.slane %v5384_v49, 5 }
  0x72   : > { %v724_v10 = vsel %vm5150_vm4, %v719_v35, %v723_v45  ;;  %v1362_v51 = vsel %vm5331_vm7, %v1360_v4, %v1361_v8  ;;  %v1374_v22 = vrot.slane %v1372_v47, 4  ;;  %v3624_v19 = vrot.slane %v5410_v29, 9 }
  0x73   : > { %v5611_v63 = vcombine.low %v714_v11, %v724_v10  ;;  %v5613_v41 = vcombine.low %v1359_v2, %v1362_v51  ;;  %v1369_v40 = vsel %vm5331_vm7, %v1367_v0, %v1368_v59  ;;  %v1379_v5 = vrot.slane %v5416_v16, 5 }
  0x74   : > { %v5617_v50 = vcombine.low %v1366_v21, %v1369_v40  ;;  %v1382_v49 = vrot.slane %v5426_v1, 5  ;;  %v1373_v45 = vsel %vm5331_vm7, %v3623_v9, %v1372_v47  ;;  %v1376_v8 = vsel %vm5331_vm7, %v1374_v22, %v1375_v42 }
  0x75   : > { %4156 = vmatmul.mubr.msk.bf16.gmra.mrb[28].mxu1 %vm775_vm3, %v5611_v63  ;;  %4310 = vmatmul.mubr.msk.bf16.gmra.mrb[12].mxu0 %vm775_vm3, %v5613_v41  ;;  %v1381_v43 = vrot.slane %v1379_v5, 4  ;;  %v1386_v55 = vrot.slane %v5459_v46, 5  ;;  %v1393_v12 = vrot.slane %v5489_v7, 5  ;;  %v1380_v59 = vsel %vm5331_vm7, %v3624_v19, %v1379_v5 }
  0x76   : > { %4161 = vmatprep.mubr.msk.bf16.mxu1 %vm775_vm3, %v3581_v20  ;;  %4313 = vmatprep.mubr.msk.bf16.mxu0 %vm775_vm3, %v5617_v50  ;;  %v5639_v20 = vcombine.low %v1373_v45, %v1376_v8  ;;  %v3625_v35 = vrot.slane %v5440_v61, 9  ;;  %v1389_v4 = vrot.slane %v5464_v3, 5  ;;  %v5645_v47 = vcombine.low %v5146_v33, %v5159_v39  ;;  %v5657_v3 = vld [vmem:[%s6301_s2 + $0x6] sm:$0x3] }
  0x77   : > { %v1383_v1 = vsel %vm5331_vm7, %v1381_v43, %v1382_v49  ;;  %v1388_v2 = vrot.slane %v1386_v55, 4  ;;  %v3626_v11 = vrot.slane %v5482_v60, 9  ;;  %v1511_v21 = vsel %vm824_vm0, %v5199_v23, 0 }
  0x78   : > { %v5650_v0 = vcombine.low %v1380_v59, %v1383_v1  ;;  %v1395_v9 = vrot.slane %v1393_v12, 4  ;;  %v1396_v10 = vrot.slane %v5502_v58, 5  ;;  %v1400_v51 = vrot.slane %v5521_v32, 5 }
  0x79   : > { %v1387_v33 = vsel %vm5331_vm7, %v3625_v35, %v1386_v55  ;;  %v1390_v39 = vsel %vm5331_vm7, %v1388_v2, %v1389_v4  ;;  %v5673_v23 = vcombine.low %v5173_v57, %v5178_v62  ;;  %v1394_v58 = vsel %vm5331_vm7, %v3626_v11, %v1393_v12 }
  0x7a   : > { %v5679_v22 = vcombine.low %v5295_v15, %v5300_v27  ;;  %v1397_v42 = vsel %vm5331_vm7, %v1395_v9, %v1396_v10  ;;  %v3627_v40 = vrot.slane %v5512_v25, 9  ;;  %v1407_v19 = vrot.slane %v5559_v53, 5 }
  0x7b   : > { %v5689_v57 = vcombine.low %v5322_v54, %v5338_v36  ;;  %v5693_v62 = vcombine.low %v1387_v33, %v1390_v39  ;;  %v1402_v15 = vrot.slane %v1400_v51, 4  ;;  %v1403_v27 = vrot.slane %v5535_v18, 5 }
  0x7c   : > { %v5703_v5 = vcombine.low %v5363_v56, %v5379_v31  ;;  %v5707_v54 = vcombine.low %v5410_v29, %v5416_v16  ;;  %v5711_v36 = vcombine.low %v5440_v61, %v5459_v46  ;;  %v5715_v18 = vcombine.low %v5482_v60, %v5489_v7  ;;  %v5734_v61 = vld [vmem:[%s5699_s11 + $0x4] sm:$0xf] }
  0x7d   : > { %4162 = vmatmul.mubr.msk.bf16.vlgmr.msra.gmra.mrb[0].mxu1 %vm775_vm3, %v5156_v38  ;;  %4314 = vmatmul.mubr.msk.bf16.gmra.mrb[16].mxu0 %vm775_vm3, %v5639_v20  ;;  %v5719_v49 = vcombine.low %v5512_v25, %v5521_v32  ;;  %v5723_v56 = vcombine.low %v5192_v14, %v5204_v28  ;;  %v5725_v31 = vcombine.low %v1394_v58, %v1397_v42  ;;  %v3628_v16 = vrot.slane %v5547_v17, 9  ;;  %v6362_v42 = vld [vmem:[#allocation8_spill] sm:$0xff] }
  0x7e   : > { %4194 = vmatpush3.bf16.msra.mxu1 %v1511_v21  ;;  %4165 = vmatprep.mubr.msk.bf16.mxu1 %vm775_vm3, %v5645_v47  ;;  %v5729_v29 = vcombine.low %v5547_v17, %v5559_v53  ;;  %v1409_v7 = vrot.slane %v1407_v19, 4  ;;  %v1410_v60 = vrot.slane %v5565_v44, 5  ;;  %v1401_v14 = vsel %vm5331_vm7, %v3627_v40, %v1400_v51  ;;  %v5754_v17 = vld [vmem:[%s5699_s11] sm:$0xf]  ;;  %v333_v53 = vld [vmem:[%s5699_s11 + $0x8] sm:$0x1] }
  0x7f   : > { %4317 = vmatprep.mubr.msk.bf16.mxu0 %vm775_vm3, %v5650_v0  ;;  %4692 = vmatprep.subr.msk.bf16.mxu1 %vm824_vm0, %v5657_v3  ;;  %v1404_v28 = vsel %vm5331_vm7, %v1402_v15, %v1403_v27  ;;  %v2143_v25 = vrot.slane %v5734_v61, 5  ;;  %v1408_v46 = vsel %vm5331_vm7, %v3628_v16, %v1407_v19  ;;  %v5759_v44 = vcombine.low %v5219_v48, %v5227_v52 }
  0x80   : > { %v1411_v32 = vsel %vm5331_vm7, %v1409_v7, %v1410_v60  ;;  %v5761_v45 = vcombine.low %v1401_v14, %v1404_v28  ;;  %v5765_v8 = vcombine.low %v5244_v13, %v5251_v24  ;;  %v1913_v43 = vshrl.u32 %v5754_v17, 16  ;;  %v3754_v60 = vld [vmem:[%s6301_s2 + $0x10] sm:$0x3]  ;;  %v4905_v14 = vld [vmem:[%s5103_s21 + $0x4] sm:$0xf] }
  0x81   : > { %v1916_v55 = vshll.u32 %v5754_v17, 16  ;;  %v1922_v12 = vshll.u32 %v5734_v61, 16  ;;  %v1926_v59 = vshrl.u32 %v5734_v61, 16  ;;  %v5771_v1 = vcombine.low %v1408_v46, %v1411_v32  ;;  %v4907_v32 = vld [vmem:[%s5103_s21] sm:$0xf] }
  0x82   : > { %v3698_v35 = vrot.slane %v5754_v17, 9  ;;  %v2145_v48 = vrot.slane %v2143_v25, 4  ;;  %v2146_v52 = vrot.slane %v333_v53, 5  ;;  %v1915_v2 = vrot.slane %v1913_v43, 4 }
  0x83   : > { %v1918_v4 = vrot.slane %v1916_v55, 5  ;;  %v1924_v11 = vrot.slane %v1922_v12, 5  ;;  %v1928_v21 = vrot.slane %v1926_v59, 4  ;;  %v1932_v9 = vshll.u32 %v333_v53, 16 }
  0x84   : > { %v2144_v10 = vsel %vm5331_vm7, %v3698_v35, %v2143_v25  ;;  %v2147_v51 = vsel %vm5331_vm7, %v2145_v48, %v2146_v52  ;;  %v5788_v40 = vcombine.low %v6362_v42, %v5278_v6  ;;  %v6363_v6 = vld [vmem:[#allocation18_spill] sm:$0xff]  ;;  %v1302_v28 = vrot.slane %v4905_v14, 5  ;;  %v6364_v48 = vld [vmem:[#allocation13_spill] sm:$0xff]  ;;  %v6365_v52 = vld [vmem:[#allocation15_spill] sm:$0xff] }
  0x85   : > { %4166 = vmatmul.mubr.msk.bf16.gmra.mrb[4].mxu1 %vm775_vm3, %v5673_v23  ;;  %4318 = vmatmul.mubr.msk.bf16.gmra.mrb[20].mxu0 %vm775_vm3, %v5693_v62  ;;  %v1919_v13 = vor.u32 %v1918_v4, %v1915_v2  ;;  %v1929_v24 = vor.u32 %v1928_v21, %v1924_v11  ;;  %v1934_v58 = vrot.slane %v1932_v9, 5  ;;  %v5790_v19 = vcombine.low %v2144_v10, %v2147_v51  ;;  %v4906_v25 = vld [vmem:[%s5103_s21 + $0x8] sm:$0x1]  ;;  %v6367_v4 = vld [vmem:[#allocation20_spill] sm:$0xff]  ;;  %v6368_v21 = vld [vmem:[#allocation23_spill] sm:$0xff] }
  0x86   : > { %4169 = vmatprep.mubr.msk.bf16.mxu1 %vm775_vm3, %v5723_v56  ;;  %4321 = vmatprep.mubr.msk.bf16.mxu0 %vm775_vm3, %v5725_v31  ;;  %v2591_v7 = vsel %vm824_vm0, %v6363_v6, 0  ;;  %v1305_v46 = vrot.slane %v4906_v25, 5  ;;  %v3613_v53 = vrot.slane %v4907_v32, 9  ;;  %v1304_v43 = vrot.slane %v1302_v28, 4  ;;  %v4908_v2 = vld [vmem:[%s6301_s2 + $0x8] sm:$0x3] }
  0x87   : > { %v1920_v33 = vrot.slane %v1919_v13, 4  ;;  %v1930_v39 = vrot.slane %v1929_v24, 4  ;;  %v1717_v35 = vsel %vm824_vm0, %v5657_v3, 0  ;;  %v6366_v3 = vld [vmem:[#allocation17_spill] sm:$0xff]  ;;  %v5885_v24 = vld [vmem:[%s5699_s11 + $0xc] sm:$0xf] }
  0x88   : > { %v1303_v55 = vsel %vm5331_vm7, %v3613_v53, %v1302_v28  ;;  %v1306_v12 = vsel %vm5331_vm7, %v1304_v43, %v1305_v46  ;;  %v6369_v13 = vld [vmem:[#allocation25_spill] sm:$0xff]  ;;  %v5888_v9 = vld [vmem:[%s5699_s11 + $0x10] sm:$0xf]  ;;  %v2803_v10 = vsel %vm824_vm0, %v3754_v60, 0  ;;  %v6375_v42 = vld [vmem:[#allocation12_spill] sm:$0xff]  ;;  %v2562_v14 = vshll.u32 %v5885_v24, 16 }
  0x89   : > { %v1925_v15 = vsel %vm5150_vm4, %v1920_v33, %v1924_v11  ;;  %v1935_v27 = vsel %vm5150_vm4, %v1930_v39, %v1934_v58  ;;  %v3630_v59 = vcombine.low %v1303_v55, %v1306_v12  ;;  %v5874_v11 = vcombine.low %v5754_v17, %v5734_v61  ;;  %v6370_v17 = vld [vmem:[#allocation6_spill] sm:$0xff]  ;;  %v6371_v51 = vld [vmem:[#allocation7_spill] sm:$0xff]  ;;  %v6372_v33 = vld [vmem:[#allocation9_spill] sm:$0xff] }
  0x8a   : > { %v5796_v16 = vcombine.low %v1925_v15, %v1935_v27  ;;  %v3718_v61 = vcombine.low %v5885_v24, %v5888_v9  ;;  %v6373_v39 = vld [vmem:[#allocation10_spill] sm:$0xff]  ;;  %v6374_v58 = vld [vmem:[#allocation11_spill] sm:$0xff]  ;;  %v6377_v27 = vld [vmem:[#allocation16_spill] sm:$0xff]  ;;  %v2572_v28 = vshrl.u32 %v5888_v9, 16  ;;  %v2564_v32 = vrot.slane %v2562_v14, 5 }
  0x8b   : > { %v6376_v15 = vld [vmem:[#allocation14_spill] sm:$0xff]  ;;  %v6378_v6 = vld [vmem:[#allocation19_spill] sm:$0xff]  ;;  %v6380_v25 = vld [vmem:[#allocation5_spill] sm:$0xff]  ;;  %v2789_v34 = vrot.slane %v5888_v9, 5 }
  0x8c   : > { %v6381_v46 = vld [vmem:[#allocation22_spill] sm:$0xff]  ;;  %v2574_v43 = vrot.slane %v2572_v28, 4  ;;  %v336_v55 = vld [vmem:[%s5699_s11 + $0x14] sm:$0x1]  ;;  %v6382_v12 = vld [vmem:[#allocation24_spill] sm:$0xff]  ;;  %s4989_s11 = smov [#allocation2]  }
  0x8d   : > { %4170 = vmatmul.mubr.msk.bf16.gmra.mrb[8].mxu1 %vm775_vm3, %v5759_v44  ;;  %4322 = vmatmul.mubr.msk.bf16.gmra.mrb[24].mxu0 %vm775_vm3, %v5761_v45  ;;  %s4913_s12 = sshll.u32 %s4989_s11, 4  ;;  %s4914_s12 = int_to_ptr.vmem [resolvable:$false] %s4913_s12 }
  0x8e   : > { %4173 = vmatprep.mubr.msk.bf16.mxu1 %vm775_vm3, %v5765_v8  ;;  %4325 = vmatprep.mubr.msk.bf16.mxu0 %vm775_vm3, %v5771_v1  ;;  %s4915_s13 = scalar_lea.vmem %s4914_s12, 4096  ;;  %p4916_p1 = scmp.lt.s32.totalorder %s6247_s6, %s4914_s12 }
  0x8f   : > { %p4917_p2 = scmp.lt.s32.totalorder %s4915_s13, %s4909_s10 }
  0x91   : > { %p4918_p3 = por %p4917_p2, %p4916_p1 }
  0x93   : > { %p4919_p5 = pnand %p4918_p3, %p4912_p0 }
  0x95   : > { %4174 = vmatmul.mubr.msk.bf16.gmra.mrb[12].mxu1 %vm775_vm3, %v5788_v40  ;;  %4326 = vmatmul.mubr.msk.bf16.gmra.mrb[28].mxu0 %vm775_vm3, %v5790_v19 }
  0x96   : > { %4177 = vmatprep.mubr.msk.bf16.mxu1 %vm775_vm3, %v5679_v22  ;;  %4331 = vmatprep.mubr.msk.bf16.mxu0 %vm775_vm3, %v5645_v47 }
  0x9d   : > { %4178 = vmatmul.mubr.msk.bf16.gmra.mrb[16].mxu1 %vm775_vm3, %v5689_v57  ;;  %4332 = vmatmul.mubr.msk.bf16.vlgmr.msra.gmra.mrb[0].mxu0 %vm775_vm3, %v5673_v23 }
  0x9e   : > { %4364 = vmatpush3.bf16.msra.mxu0 %v2591_v7  ;;  %4181 = vmatprep.mubr.msk.bf16.mxu1 %vm775_vm3, %v5703_v5  ;;  %v6379_v7 = vld [vmem:[#allocation21_spill] sm:$0xff] }
  0x9f   : > { %4335 = vmatprep.mubr.msk.bf16.mxu0 %vm775_vm3, %v5723_v56  ;;  %4698 = vmatprep.subr.msk.bf16.mxu0 %vm824_vm0, %v3754_v60  ;;  %v2559_v60 = vshrl.u32 %v5885_v24, 16 }
  0xa5   : > { %4182 = vmatmul.mubr.msk.bf16.gmra.mrb[20].mxu1 %vm775_vm3, %v5707_v54  ;;  %4336 = vmatmul.mubr.msk.bf16.gmra.mrb[4].mxu0 %vm775_vm3, %v5759_v44 }
  0xa6   : > { %4185 = vmatprep.mubr.msk.bf16.mxu1 %vm775_vm3, %v5711_v36  ;;  %4339 = vmatprep.mubr.msk.bf16.mxu0 %vm775_vm3, %v5765_v8 }
  0xad   : > { %4186 = vmatmul.mubr.msk.bf16.gmra.mrb[24].mxu1 %vm775_vm3, %v5715_v18  ;;  %4340 = vmatmul.mubr.msk.bf16.gmra.mrb[8].mxu0 %vm775_vm3, %v5788_v40 }
  0xae   : > { %4189 = vmatprep.mubr.msk.bf16.mxu1 %vm775_vm3, %v5719_v49  ;;  %4343 = vmatprep.mubr.msk.bf16.mxu0 %vm775_vm3, %v5679_v22 }
  0xb5   : > { %4190 = vmatmul.mubr.msk.bf16.gmra.mrb[28].mxu1 %vm775_vm3, %v5729_v29  ;;  %4344 = vmatmul.mubr.msk.bf16.gmra.mrb[12].mxu0 %vm775_vm3, %v5689_v57 }
  0xb6   : > { %4195 = vmatprep.mubr.msk.bf16.mxu1 %vm775_vm3, %v3630_v59  ;;  %4347 = vmatprep.mubr.msk.bf16.mxu0 %vm775_vm3, %v5703_v5 }
  0xbd   : > { %4196 = vmatmul.mubr.msk.bf16.vlgmr.msra.gmra.mrb[0].mxu1 %vm775_vm3, %v6364_v48  ;;  %4348 = vmatmul.mubr.msk.bf16.gmra.mrb[16].mxu0 %vm775_vm3, %v5707_v54 }
  0xbe   : > { %4228 = vmatpush3.bf16.msra.mxu1 %v1717_v35  ;;  %4199 = vmatprep.mubr.msk.bf16.mxu1 %vm775_vm3, %v6365_v52  ;;  %v2578_v35 = vshll.u32 %v336_v55, 16 }
  0xbf   : > { %4351 = vmatprep.mubr.msk.bf16.mxu0 %vm775_vm3, %v5711_v36  ;;  %4694 = vmatprep.subr.msk.bf16.mxu1 %vm824_vm0, %v4908_v2 }
  0xc5   : > { %4200 = vmatmul.mubr.msk.bf16.gmra.mrb[4].mxu1 %vm775_vm3, %v6366_v3  ;;  %4352 = vmatmul.mubr.msk.bf16.gmra.mrb[20].mxu0 %vm775_vm3, %v5715_v18 }
  0xc6   : > { %4203 = vmatprep.mubr.msk.bf16.mxu1 %vm775_vm3, %v6367_v4  ;;  %4355 = vmatprep.mubr.msk.bf16.mxu0 %vm775_vm3, %v5719_v49 }
  0xcd   : > { %4204 = vmatmul.mubr.msk.bf16.gmra.mrb[8].mxu1 %vm775_vm3, %v6368_v21  ;;  %4356 = vmatmul.mubr.msk.bf16.gmra.mrb[24].mxu0 %vm775_vm3, %v5729_v29 }
  0xce   : > { %4207 = vmatprep.mubr.msk.bf16.mxu1 %vm775_vm3, %v6369_v13  ;;  %4359 = vmatprep.mubr.msk.bf16.mxu0 %vm775_vm3, %v5874_v11 }
  0xd5   : > { %4208 = vmatmul.mubr.msk.bf16.gmra.mrb[12].mxu1 %vm775_vm3, %v5582_v37  ;;  %4360 = vmatmul.mubr.msk.bf16.gmra.mrb[28].mxu0 %vm775_vm3, %v3718_v61  ;;  %v2580_v61 = vrot.slane %v2578_v35, 5 }
  0xd6   : > { %4211 = vmatprep.mubr.msk.bf16.mxu1 %vm775_vm3, %v5613_v41  ;;  %4365 = vmatprep.mubr.msk.bf16.mxu0 %vm775_vm3, %v6370_v17 }
  0xdd   : > { %4212 = vmatmul.mubr.msk.bf16.gmra.mrb[16].mxu1 %vm775_vm3, %v5617_v50  ;;  %4366 = vmatmul.mubr.msk.bf16.vlgmr.msra.gmra.mrb[0].mxu0 %vm775_vm3, %v6371_v51 }
  0xde   : > { %4398 = vmatpush3.bf16.msra.mxu0 %v2803_v10  ;;  %4215 = vmatprep.mubr.msk.bf16.mxu1 %vm775_vm3, %v5639_v20 }
  0xdf   : > { %4369 = vmatprep.mubr.msk.bf16.mxu0 %vm775_vm3, %v6372_v33 }
  0xe5   : > { %4216 = vmatmul.mubr.msk.bf16.gmra.mrb[20].mxu1 %vm775_vm3, %v5650_v0  ;;  %4370 = vmatmul.mubr.msk.bf16.gmra.mrb[4].mxu0 %vm775_vm3, %v6373_v39 }
  0xe6   : > { %4219 = vmatprep.mubr.msk.bf16.mxu1 %vm775_vm3, %v5693_v62  ;;  %4373 = vmatprep.mubr.msk.bf16.mxu0 %vm775_vm3, %v6374_v58 }
  0xed   : > { %4220 = vmatmul.mubr.msk.bf16.gmra.mrb[24].mxu1 %vm775_vm3, %v5725_v31  ;;  %4374 = vmatmul.mubr.msk.bf16.gmra.mrb[8].mxu0 %vm775_vm3, %v6375_v42 }
  0xee   : > { %4223 = vmatprep.mubr.msk.bf16.mxu1 %vm775_vm3, %v5761_v45  ;;  %4377 = vmatprep.mubr.msk.bf16.mxu0 %vm775_vm3, %v6376_v15 }
  0xf5   : > { %4224 = vmatmul.mubr.msk.bf16.gmra.mrb[28].mxu1 %vm775_vm3, %v5771_v1  ;;  %4378 = vmatmul.mubr.msk.bf16.gmra.mrb[12].mxu0 %vm775_vm3, %v6377_v27 }
  0xf6   : > { %4229 = vmatprep.mubr.msk.bf16.mxu1 %vm775_vm3, %v5156_v38  ;;  %4381 = vmatprep.mubr.msk.bf16.mxu0 %vm775_vm3, %v6378_v6  ;;  %v2568_v38 = vshll.u32 %v5888_v9, 16 }
  0xf8   : > { %v2570_v53 = vrot.slane %v2568_v38, 5 }
  0xfa   : > { %v2575_v59 = vor.u32 %v2574_v43, %v2570_v53 }
  0xfc   : > { %v2576_v2 = vrot.slane %v2575_v59, 4 }
  0xfd   : > { %4230 = vmatmul.mubr.msk.bf16.vlgmr.msra.gmra.mrb[0].mxu1 %vm775_vm3, %v5645_v47  ;;  %4382 = vmatmul.mubr.msk.bf16.gmra.mrb[16].mxu0 %vm775_vm3, %v6379_v7  ;;  %v2561_v47 = vrot.slane %v2559_v60, 4 }
  0xfe   : > { %4432 = vmatpush3.bf16.msra.mxu1 %v6380_v25  ;;  %4233 = vmatprep.mubr.msk.bf16.mxu1 %vm775_vm3, %v5673_v23 }
  0xff   : > { %4385 = vmatprep.mubr.msk.bf16.mxu0 %vm775_vm3, %v6381_v46  ;;  %v2565_v23 = vor.u32 %v2564_v32, %v2561_v47 }
 0x101   : > { %v2566_v48 = vrot.slane %v2565_v23, 4 }
 0x105   : > { %4234 = vmatmul.mubr.msk.bf16.gmra.mrb[4].mxu1 %vm775_vm3, %v5723_v56  ;;  %4386 = vmatmul.mubr.msk.bf16.gmra.mrb[20].mxu0 %vm775_vm3, %v6382_v12  ;;  %v2571_v56 = vsel %vm5150_vm4, %v2566_v48, %v2570_v53 }
 0x106   : > { %4237 = vmatprep.mubr.msk.bf16.mxu1 %vm775_vm3, %v5759_v44  ;;  %4389 = vmatprep.mubr.msk.bf16.mxu0 %vm775_vm3, %v5584_v30  ;;  %v2581_v44 = vsel %vm5150_vm4, %v2576_v2, %v2580_v61 }
 0x107   : > { %v3736_v17 = vcombine.low %v2571_v56, %v2581_v44 }
 0x10d   : > { %4238 = vmatmul.mubr.msk.bf16.gmra.mrb[8].mxu1 %vm775_vm3, %v5765_v8  ;;  %4390 = vmatmul.mubr.msk.bf16.gmra.mrb[24].mxu0 %vm775_vm3, %v5611_v63 }
 0x10e   : > { %4241 = vmatprep.mubr.msk.bf16.mxu1 %vm775_vm3, %v5788_v40  ;;  %4393 = vmatprep.mubr.msk.bf16.mxu0 %vm775_vm3, %v5796_v16 }
 0x115   : > { %4242 = vmatmul.mubr.msk.bf16.gmra.mrb[12].mxu1 %vm775_vm3, %v5679_v22  ;;  %4394 = vmatmul.mubr.msk.bf16.gmra.mrb[28].mxu0 %vm775_vm3, %v3736_v17 }
 0x116   : > { %4245 = vmatprep.mubr.msk.bf16.mxu1 %vm775_vm3, %v5689_v57  ;;  %4399 = vmatprep.mubr.msk.bf16.mxu0 %vm775_vm3, %v6365_v52 }
 0x11d   : > { %4246 = vmatmul.mubr.msk.bf16.gmra.mrb[16].mxu1 %vm775_vm3, %v5703_v5  ;;  %4400 = vmatmul.mubr.msk.bf16.vlgmr.msra.gmra.mrb[0].mxu0 %vm775_vm3, %v6366_v3 }
 0x11e   : > { %4249 = vmatprep.mubr.msk.bf16.mxu1 %vm775_vm3, %v5707_v54  ;;  %4403 = vmatprep.mubr.msk.bf16.mxu0 %vm775_vm3, %v6367_v4 }
 0x125   : > { %4250 = vmatmul.mubr.msk.bf16.gmra.mrb[20].mxu1 %vm775_vm3, %v5711_v36  ;;  %4404 = vmatmul.mubr.msk.bf16.gmra.mrb[4].mxu0 %vm775_vm3, %v6368_v21 }
 0x126   : > { %4253 = vmatprep.mubr.msk.bf16.mxu1 %vm775_vm3, %v5715_v18  ;;  %4407 = vmatprep.mubr.msk.bf16.mxu0 %vm775_vm3, %v6369_v13 }
 0x12d   : > { %4254 = vmatmul.mubr.msk.bf16.gmra.mrb[24].mxu1 %vm775_vm3, %v5719_v49  ;;  %4408 = vmatmul.mubr.msk.bf16.gmra.mrb[8].mxu0 %vm775_vm3, %v5582_v37  ;;  %v3753_v37 = vrot.slane %v5885_v24, 9 }
 0x12e   : > { %4257 = vmatprep.mubr.msk.bf16.mxu1 %vm775_vm3, %v5729_v29  ;;  %4411 = vmatprep.mubr.msk.bf16.mxu0 %vm775_vm3, %v5613_v41  ;;  %v2791_v41 = vrot.slane %v2789_v34, 4 }
 0x135   : > { %4258 = vmatmul.mubr.msk.bf16.gmra.mrb[28].mxu1 %vm775_vm3, %v5874_v11  ;;  %4412 = vmatmul.mubr.msk.bf16.gmra.mrb[12].mxu0 %vm775_vm3, %v5617_v50  ;;  %v2792_v50 = vrot.slane %v336_v55, 5 }
 0x136   : > { %4279 = vmatprep.mubr.msk.bf16.mxu1 %vm775_vm3, %v6377_v27  ;;  %4415 = vmatprep.mubr.msk.bf16.mxu0 %vm775_vm3, %v5639_v20  ;;  %v2790_v20 = vsel %vm5331_vm7, %v3753_v37, %v2789_v34 }
 0x13d   : > { %4280 = vmatmul.mubr.msk.bf16.vlgmr.msra.gmra.mrb[16].mxu1 %vm775_vm3, %v6378_v6  ;;  %4416 = vmatmul.mubr.msk.bf16.gmra.mrb[16].mxu0 %vm775_vm3, %v5650_v0  ;;  %v2793_v0 = vsel %vm5331_vm7, %v2791_v41, %v2792_v50 }
 0x13e   : > { %4283 = vmatprep.mubr.msk.bf16.mxu1 %vm775_vm3, %v6379_v7  ;;  %4419 = vmatprep.mubr.msk.bf16.mxu0 %vm775_vm3, %v5693_v62  ;;  %v3755_v22 = vcombine.low %v2790_v20, %v2793_v0 }
 0x145   : > { %4284 = vmatmul.mubr.msk.bf16.gmra.mrb[20].mxu1 %vm775_vm3, %v6381_v46  ;;  %4420 = vmatmul.mubr.msk.bf16.gmra.mrb[20].mxu0 %vm775_vm3, %v5725_v31 }
 0x146   : > { %4287 = vmatprep.mubr.msk.bf16.mxu1 %vm775_vm3, %v6382_v12  ;;  %4423 = vmatprep.mubr.msk.bf16.mxu0 %vm775_vm3, %v5761_v45 }
 0x14d   : > { %4288 = vmatmul.mubr.msk.bf16.gmra.mrb[24].mxu1 %vm775_vm3, %v5584_v30  ;;  %4424 = vmatmul.mubr.msk.bf16.gmra.mrb[24].mxu0 %vm775_vm3, %v5771_v1 }
 0x14e   : > { %4291 = vmatprep.mubr.msk.bf16.mxu1 %vm775_vm3, %v5611_v63  ;;  %4427 = vmatprep.mubr.msk.bf16.mxu0 %vm775_vm3, %v5790_v19 }
 0x155   : > { %4292 = vmatmul.mubr.msk.bf16.gmra.mrb[28].mxu1 %vm775_vm3, %v5796_v16  ;;  %4428 = vmatmul.mubr.msk.bf16.gmra.mrb[28].mxu0 %vm775_vm3, %v3755_v22  ;;  %v6051_v16 = vld [vmem:[%s6302_s3] ss:$0 sm:$0xff] }
 0x1d0   : > { %v4231_v30 = vpop.f32.mrb[0].mxu1 }
 0x1d1   : > { %v1753_v57 = vpop.f32.mrb[1].mxu1 }
 0x1d2   : > { %v4232_v62 = vpop.f32.mrb[2].mxu1 }
 0x1d3   : > { %v1756_v5 = vpop.f32.mrb[3].mxu1 }
 0x1d8   : > { %v4235_v63 = vpop.f32.mrb[4].mxu1 }
 0x1d9   : > { %v1769_v54 = vpop.f32.mrb[5].mxu1 }
 0x1da   : > { %v4236_v36 = vpop.f32.mrb[6].mxu1 }
 0x1db   : > { %v1772_v18 = vpop.f32.mrb[7].mxu1 }
 0x1e0   : > { %v4239_v49 = vpop.f32.mrb[8].mxu1 }
 0x1e1   : > { %v1785_v31 = vpop.f32.mrb[9].mxu1 }
 0x1e2   : > { %v4240_v29 = vpop.f32.mrb[10].mxu1 }
 0x1e3   : > { %v6038_v45 = vpop.f32.mrb[11].mxu1 }
 0x1e8   : > { %v6040_v26 = vpop.f32.mrb[12].mxu1 }
 0x1e9   : > { %v6042_v8 = vpop.f32.mrb[13].mxu1 }
 0x1ea   : > { %v6044_v1 = vpop.f32.mrb[14].mxu1 }
 0x1eb   : > { %v6046_v40 = vpop.f32.mrb[15].mxu1 }
 0x1f0   : > { %v4401_v19 = vpop.f32.mrb[0].mxu0 }
 0x1f1   : > { %v4433_v52 = vadd.f32 %v4401_v19, %v4231_v30  ;;  %v2839_v3 = vpop.f32.mrb[1].mxu0 }
 0x1f2   : > { %v4434_v4 = vadd.f32 %v2839_v3, %v1753_v57  ;;  %v4402_v11 = vpop.f32.mrb[2].mxu0 }
 0x1f3   : > { %v6054_v21 = vadd.f32 %v4433_v52, %v6051_v16  ;;  %v4435_v13 = vadd.f32 %v4402_v11, %v4232_v62  ;;  %v2842_v24 = vpop.f32.mrb[3].mxu0 }
 0x1f4   : > { %v6057_v9 = vadd.f32 %v4434_v4, %v6051_v16  ;;  %v4436_v10 = vadd.f32 %v2842_v24, %v1756_v5 }
 0x1f5   : > { %v3775_v51 = vmul.f32 -1.442695, %v6054_v21  ;;  %v6061_v33 = vadd.f32 %v4435_v13, %v6051_v16 }
 0x1f6   : > { %v3773_v39 = vmul.f32 -1.442695, %v6057_v9  ;;  %v6065_v58 = vadd.f32 %v4436_v10, %v6051_v16 }
 0x1f7   : > { %4777 = vpow2.f32 %v3775_v51  ;;  %v3776_v42 = vmul.f32 -1.442695, %v6061_v33 }
 0x1f8   : > { %4779 = vpow2.f32 %v3773_v39  ;;  %v3774_v15 = vmul.f32 -1.442695, %v6065_v58  ;;  %v4405_v27 = vpop.f32.mrb[4].mxu0 }
 0x1f9   : > { %4781 = vpow2.f32 %v3776_v42  ;;  %v4437_v6 = vadd.f32 %v4405_v27, %v4235_v63  ;;  %v2855_v7 = vpop.f32.mrb[5].mxu0 }
 0x1fa   : > { %4783 = vpow2.f32 %v3774_v15  ;;  %v4438_v60 = vadd.f32 %v2855_v7, %v1769_v54  ;;  %v4406_v14 = vpop.f32.mrb[6].mxu0 }
 0x1fb   : > { %v6070_v28 = vadd.f32 %v4437_v6, %v6051_v16  ;;  %v4439_v25 = vadd.f32 %v4406_v14, %v4236_v36  ;;  %v2858_v38 = vpop.f32.mrb[7].mxu0 }
 0x1fc   : > { %v6073_v46 = vadd.f32 %v4438_v60, %v6051_v16  ;;  %v4440_v47 = vadd.f32 %v2858_v38, %v1772_v18 }
 0x1fd   : > { %v3779_v32 = vmul.f32 -1.442695, %v6070_v28  ;;  %v6077_v53 = vadd.f32 %v4439_v25, %v6051_v16 }
 0x1fe   : > { %v3777_v43 = vmul.f32 -1.442695, %v6073_v46  ;;  %v6081_v55 = vadd.f32 %v4440_v47, %v6051_v16 }
 0x1ff   : > { %4785 = vpow2.f32 %v3779_v32  ;;  %v3780_v12 = vmul.f32 -1.442695, %v6077_v53 }
 0x200   : > { %4787 = vpow2.f32 %v3777_v43  ;;  %v3778_v23 = vmul.f32 -1.442695, %v6081_v55  ;;  %v4409_v59 = vpop.f32.mrb[8].mxu0 }
 0x201   : > { %v4778_v35 = vpop.eup %4777  ;;  %4789 = vpow2.f32 %v3780_v12  ;;  %v4441_v48 = vadd.f32 %v4409_v59, %v4239_v49  ;;  %v2871_v2 = vpop.f32.mrb[9].mxu0 }
 0x202   : > { %v4780_v61 = vpop.eup %4779  ;;  %v3135_v56 = vadd.f32 1.0, %v4778_v35  ;;  %4791 = vpow2.f32 %v3778_v23  ;;  %v4442_v44 = vadd.f32 %v2871_v2, %v1785_v31  ;;  %v4410_v17 = vpop.f32.mrb[10].mxu0 }
 0x203   : > { %v4782_v34 = vpop.eup %4781  ;;  %v3133_v37 = vadd.f32 1.0, %v4780_v61  ;;  %v6086_v41 = vadd.f32 %v4441_v48, %v6051_v16  ;;  %v4443_v50 = vadd.f32 %v4410_v17, %v4240_v29  ;;  %v2874_v20 = vpop.f32.mrb[11].mxu0 }
 0x204   : > { %v4784_v0 = vpop.eup %4783  ;;  %4793 = vrcp.f32 %v3135_v56  ;;  %v3136_v22 = vadd.f32 1.0, %v4782_v34  ;;  %v6089_v30 = vadd.f32 %v4442_v44, %v6051_v16  ;;  %v4444_v57 = vadd.f32 %v2874_v20, %v6038_v45 }
 0x205   : > { %4795 = vrcp.f32 %v3133_v37  ;;  %v3134_v62 = vadd.f32 1.0, %v4784_v0  ;;  %v3783_v5 = vmul.f32 -1.442695, %v6086_v41  ;;  %v6094_v63 = vadd.f32 %v4443_v50, %v6051_v16 }
 0x206   : > { %4797 = vrcp.f32 %v3136_v22  ;;  %v3781_v54 = vmul.f32 -1.442695, %v6089_v30  ;;  %v6098_v36 = vadd.f32 %v4444_v57, %v6051_v16 }
 0x207   : > { %4799 = vrcp.f32 %v3134_v62  ;;  %v3784_v18 = vmul.f32 -1.442695, %v6094_v63 }
 0x208   : > { %4801 = vpow2.f32 %v3783_v5  ;;  %v3782_v49 = vmul.f32 -1.442695, %v6098_v36  ;;  %v4413_v31 = vpop.f32.mrb[12].mxu0 }
 0x209   : > { %v4786_v29 = vpop.eup %4785  ;;  %4803 = vpow2.f32 %v3781_v54  ;;  %v4445_v45 = vadd.f32 %v4413_v31, %v6040_v26  ;;  %v2887_v19 = vpop.f32.mrb[13].mxu0 }
 0x20a   : > { %v4788_v52 = vpop.eup %4787  ;;  %v3139_v3 = vadd.f32 1.0, %v4786_v29  ;;  %4805 = vpow2.f32 %v3784_v18  ;;  %v4446_v4 = vadd.f32 %v2887_v19, %v6042_v8  ;;  %v4414_v11 = vpop.f32.mrb[14].mxu0 }
 0x20b   : > { %v4790_v13 = vpop.eup %4789  ;;  %v3137_v24 = vadd.f32 1.0, %v4788_v52  ;;  %4807 = vpow2.f32 %v3782_v49  ;;  %v6105_v10 = vadd.f32 %v4445_v45, %v6051_v16  ;;  %v4447_v51 = vadd.f32 %v4414_v11, %v6044_v1  ;;  %v2890_v39 = vpop.f32.mrb[15].mxu0 }
 0x20c   : > { %v4792_v42 = vpop.eup %4791  ;;  %4809 = vrcp.f32 %v3139_v3  ;;  %v3140_v26 = vadd.f32 1.0, %v4790_v13  ;;  %v6110_v15 = vadd.f32 %v4446_v4, %v6051_v16  ;;  %v4448_v8 = vadd.f32 %v2890_v39, %v6046_v40 }
 0x20d   : > { %4811 = vrcp.f32 %v3137_v24  ;;  %v3138_v27 = vadd.f32 1.0, %v4792_v42  ;;  %v3787_v6 = vmul.f32 -1.442695, %v6105_v10  ;;  %v6115_v7 = vadd.f32 %v4447_v51, %v6051_v16 }
 0x20e   : > { %v4794_v60 = vpop.eup %4793  ;;  %4813 = vrcp.f32 %v3140_v26  ;;  %v3785_v1 = vmul.f32 -1.442695, %v6110_v15  ;;  %v6119_v14 = vadd.f32 %v4448_v8, %v6051_v16 }
 0x20f   : > { %v4796_v25 = vpop.eup %4795  ;;  %4815 = vrcp.f32 %v3138_v27  ;;  %v3788_v40 = vmul.f32 -1.442695, %v6115_v7  ;;  %v3231_v23 = vmul.f32 %v4794_v60, %v6054_v21 }
 0x210   : > { %v4798_v38 = vpop.eup %4797  ;;  %4817 = vpow2.f32 %v3787_v6  ;;  %v3786_v47 = vmul.f32 -1.442695, %v6119_v14  ;;  %v4281_v32 = vpop.f32.mrb[16].mxu1  ;;  %v3229_v56 = vmul.f32 %v4796_v25, %v6057_v9 }
 0x211   : > { %v4417_v43 = vpop.f32.mrb[16].mxu0  ;;  %v4800_v12 = vpop.eup %4799  ;;  %v3232_v59 = vmul.f32 %v4798_v38, %v6061_v33  ;;  %4819 = vpow2.f32 %v3785_v1 }
 0x212   : > { %v4449_v35 = vadd.f32 %v4417_v43, %v4281_v32  ;;  %v2045_v48 = vpop.f32.mrb[17].mxu1  ;;  %v2903_v2 = vpop.f32.mrb[17].mxu0  ;;  %v3230_v44 = vmul.f32 %v4800_v12, %v6065_v58  ;;  %4821 = vpow2.f32 %v3788_v40 }
 0x213   : > { %v4802_v61 = vpop.eup %4801  ;;  %v4450_v17 = vadd.f32 %v2903_v2, %v2045_v48  ;;  %v4282_v34 = vpop.f32.mrb[18].mxu1  ;;  %v3885_v20 = vpack.c.bf16 %v3232_v59, %v3231_v23  ;;  %4823 = vpow2.f32 %v3786_v47 }
 0x214   : > { %v4418_v37 = vpop.f32.mrb[18].mxu0  ;;  %v4804_v50 = vpop.eup %4803  ;;  %v3143_v0 = vadd.f32 1.0, %v4802_v61  ;;  %v6132_v21 = vadd.f32 %v4449_v35, %v6051_v16  ;;  %v3880_v62 = vpack.c.bf16 %v3230_v44, %v3229_v56 }
 0x215   : > { %v2048_v33 = vpop.f32.mrb[19].mxu1  ;;  %v2906_v22 = vpop.f32.mrb[19].mxu0  ;;  %v3141_v5 = vadd.f32 1.0, %v4804_v50  ;;  %v6135_v9 = vadd.f32 %v4450_v17, %v6051_v16  ;;  %v4451_v58 = vadd.f32 %v4418_v37, %v4282_v34  ;;  %3957 = vst [vmem:[%s6138_s30 + $0x8] sm:$0xff] %v3885_v20  }
 0x216   : > { %v4806_v57 = vpop.eup %4805  ;;  %4825 = vrcp.f32 %v3143_v0  ;;  %v3791_v49 = vmul.f32 -1.442695, %v6132_v21  ;;  %v4452_v31 = vadd.f32 %v2906_v22, %v2048_v33  ;;  %3881 = vst [vmem:[%s6138_s30] sm:$0xff] %v3880_v62  }
 0x217   : > { %v4808_v54 = vpop.eup %4807  ;;  %v3144_v18 = vadd.f32 1.0, %v4806_v57  ;;  %4827 = vrcp.f32 %v3141_v5  ;;  %v3789_v19 = vmul.f32 -1.442695, %v6135_v9  ;;  %v6145_v52 = vadd.f32 %v4451_v58, %v6051_v16 }
 0x218   : > { %v4810_v29 = vpop.eup %4809  ;;  %v3142_v45 = vadd.f32 1.0, %v4808_v54  ;;  %v6148_v4 = vadd.f32 %v4452_v31, %v6051_v16  ;;  %v4285_v51 = vpop.f32.mrb[20].mxu1 }
 0x219   : > { %v4812_v3 = vpop.eup %4811  ;;  %4829 = vrcp.f32 %v3144_v18  ;;  %v3235_v13 = vmul.f32 %v4810_v29, %v6070_v28  ;;  %v3792_v24 = vmul.f32 -1.442695, %v6145_v52  ;;  %v4421_v39 = vpop.f32.mrb[20].mxu0 }
 0x21a   : > { %v4814_v11 = vpop.eup %4813  ;;  %4831 = vrcp.f32 %v3142_v45  ;;  %v3790_v8 = vmul.f32 -1.442695, %v6148_v4  ;;  %v4453_v27 = vadd.f32 %v4421_v39, %v4285_v51  ;;  %v2061_v6 = vpop.f32.mrb[21].mxu1  ;;  %v3233_v25 = vmul.f32 %v4812_v3, %v6073_v46 }
 0x21b   : > { %v4816_v42 = vpop.eup %4815  ;;  %v3236_v26 = vmul.f32 %v4814_v11, %v6077_v53  ;;  %4833 = vpow2.f32 %v3791_v49  ;;  %v2919_v60 = vpop.f32.mrb[21].mxu0 }
 0x21c   : > { %v4818_v1 = vpop.eup %4817  ;;  %v3234_v40 = vmul.f32 %v4816_v42, %v6081_v55  ;;  %4835 = vpow2.f32 %v3789_v19  ;;  %v4454_v28 = vadd.f32 %v2919_v60, %v2061_v6  ;;  %v4286_v38 = vpop.f32.mrb[22].mxu1  ;;  %v6157_v53 = vadd.f32 %v4453_v27, %v6051_v16 }
 0x21d   : > { %v4422_v47 = vpop.f32.mrb[22].mxu0  ;;  %v4820_v32 = vpop.eup %4819  ;;  %v3895_v43 = vpack.c.bf16 %v3236_v26, %v3235_v13  ;;  %v3147_v12 = vadd.f32 1.0, %v4818_v1  ;;  %4837 = vpow2.f32 %v3792_v24 }
 0x21e   : > { %v2064_v23 = vpop.f32.mrb[23].mxu1  ;;  %v2922_v59 = vpop.f32.mrb[23].mxu0  ;;  %v3890_v48 = vpack.c.bf16 %v3234_v40, %v3233_v25  ;;  %v3145_v46 = vadd.f32 1.0, %v4820_v32  ;;  %4839 = vpow2.f32 %v3790_v8  ;;  %v6160_v55 = vadd.f32 %v4454_v28, %v6051_v16 }
 0x21f   : > { %v4822_v35 = vpop.eup %4821  ;;  %3959 = vst [vmem:[%s6138_s30 + $0x18] sm:$0xff] %v3895_v43   ;;  %4841 = vrcp.f32 %v3147_v12  ;;  %v3795_v56 = vmul.f32 -1.442695, %v6157_v53  ;;  %v4455_v44 = vadd.f32 %v4422_v47, %v4286_v38  ;;  %v4456_v37 = vadd.f32 %v2922_v59, %v2064_v23 }
 0x220   : > { %v4824_v2 = vpop.eup %4823  ;;  %v3148_v61 = vadd.f32 1.0, %v4822_v35  ;;  %3958 = vst [vmem:[%s6138_s30 + $0x10] sm:$0xff] %v3890_v48   ;;  %4843 = vrcp.f32 %v3145_v46  ;;  %v3793_v34 = vmul.f32 -1.442695, %v6160_v55  ;;  %v4289_v57 = vpop.f32.mrb[24].mxu1 }
 0x221   : > { %v3146_v17 = vadd.f32 1.0, %v4824_v2  ;;  %v4826_v50 = vpop.eup %4825  ;;  %v6167_v20 = vadd.f32 %v4455_v44, %v6051_v16  ;;  %v6171_v22 = vadd.f32 %v4456_v37, %v6051_v16  ;;  %v4425_v62 = vpop.f32.mrb[24].mxu0 }
 0x222   : > { %4845 = vrcp.f32 %v3148_v61  ;;  %v4828_v0 = vpop.eup %4827  ;;  %v3239_v33 = vmul.f32 %v4826_v50, %v6086_v41  ;;  %v4457_v18 = vadd.f32 %v4425_v62, %v4289_v57  ;;  %v2077_v49 = vpop.f32.mrb[25].mxu1 }
 0x223   : > { %4847 = vrcp.f32 %v3146_v17  ;;  %v4830_v5 = vpop.eup %4829  ;;  %v3237_v58 = vmul.f32 %v4828_v0, %v6089_v30  ;;  %v3796_v54 = vmul.f32 -1.442695, %v6167_v20  ;;  %v2935_v31 = vpop.f32.mrb[25].mxu0  ;;  %v3794_v41 = vmul.f32 -1.442695, %v6171_v22 }
 0x224   : > { %4849 = vpow2.f32 %v3795_v56  ;;  %v4832_v29 = vpop.eup %4831  ;;  %v3240_v45 = vmul.f32 %v4830_v5, %v6094_v63  ;;  %v4458_v19 = vadd.f32 %v2935_v31, %v2077_v49  ;;  %v4290_v3 = vpop.f32.mrb[26].mxu1  ;;  %v6179_v30 = vadd.f32 %v4457_v18, %v6051_v16 }
 0x225   : > { %4851 = vpow2.f32 %v3793_v34  ;;  %v4426_v11 = vpop.f32.mrb[26].mxu0  ;;  %v4834_v13 = vpop.eup %4833  ;;  %v3238_v24 = vmul.f32 %v4832_v29, %v6098_v36 }
 0x226   : > { %4853 = vpow2.f32 %v3796_v54  ;;  %v4459_v51 = vadd.f32 %v4426_v11, %v4290_v3  ;;  %v2080_v39 = vpop.f32.mrb[27].mxu1  ;;  %v2938_v42 = vpop.f32.mrb[27].mxu0  ;;  %v3905_v63 = vpack.c.bf16 %v3240_v45, %v3239_v33  ;;  %v3151_v8 = vadd.f32 1.0, %v4834_v13 }
 0x227   : > { %v4836_v26 = vpop.eup %4835  ;;  %4855 = vpow2.f32 %v3794_v41  ;;  %v6182_v27 = vadd.f32 %v4458_v19, %v6051_v16  ;;  %v3900_v60 = vpack.c.bf16 %v3238_v24, %v3237_v58  ;;  %v3799_v28 = vmul.f32 -1.442695, %v6179_v30 }
 0x228   : > { %v4838_v6 = vpop.eup %4837  ;;  %v3149_v1 = vadd.f32 1.0, %v4836_v26  ;;  %v6185_v36 = vadd.f32 %v4459_v51, %v6051_v16  ;;  %3961 = vst [vmem:[%s6138_s30 + $0x28] sm:$0xff] %v3905_v63   ;;  %4857 = vrcp.f32 %v3151_v8  ;;  %v4460_v38 = vadd.f32 %v2938_v42, %v2080_v39  ;;  %v4293_v35 = vpop.f32.mrb[28].mxu1 }
 0x229   : > { %v4840_v25 = vpop.eup %4839  ;;  %v3152_v40 = vadd.f32 1.0, %v4838_v6  ;;  %3960 = vst [vmem:[%s6138_s30 + $0x20] sm:$0xff] %v3900_v60   ;;  %v3797_v43 = vmul.f32 -1.442695, %v6182_v27  ;;  %v4429_v48 = vpop.f32.mrb[28].mxu0 }
 0x22a   : > { %v4842_v47 = vpop.eup %4841  ;;  %4859 = vrcp.f32 %v3149_v1  ;;  %v3150_v32 = vadd.f32 1.0, %v4840_v25  ;;  %v3800_v23 = vmul.f32 -1.442695, %v6185_v36  ;;  %v6193_v59 = vadd.f32 %v4460_v38, %v6051_v16  ;;  %v2093_v44 = vpop.f32.mrb[29].mxu1 }
 0x22b   : > { %v4844_v12 = vpop.eup %4843  ;;  %4861 = vrcp.f32 %v3152_v40  ;;  %v3243_v2 = vmul.f32 %v4842_v47, %v6105_v10  ;;  %v4461_v56 = vadd.f32 %v4429_v48, %v4293_v35  ;;  %v2951_v17 = vpop.f32.mrb[29].mxu0 }
 0x22c   : > { %v4846_v46 = vpop.eup %4845  ;;  %v3241_v61 = vmul.f32 %v4844_v12, %v6110_v15  ;;  %4863 = vrcp.f32 %v3150_v32  ;;  %v3798_v50 = vmul.f32 -1.442695, %v6193_v59  ;;  %v4462_v0 = vadd.f32 %v2951_v17, %v2093_v44  ;;  %v4294_v33 = vpop.f32.mrb[30].mxu1 }
 0x22d   : > { %v4848_v34 = vpop.eup %4847  ;;  %v3244_v37 = vmul.f32 %v4846_v46, %v6115_v7  ;;  %4865 = vpow2.f32 %v3799_v28  ;;  %v4430_v57 = vpop.f32.mrb[30].mxu0  ;;  %v6201_v10 = vadd.f32 %v4461_v56, %v6051_v16 }
 0x22e   : > { %v4850_v62 = vpop.eup %4849  ;;  %v3242_v5 = vmul.f32 %v4848_v34, %v6119_v14  ;;  %4867 = vpow2.f32 %v3797_v43  ;;  %v4463_v15 = vadd.f32 %v4430_v57, %v4294_v33  ;;  %v2096_v58 = vpop.f32.mrb[31].mxu1  ;;  %v6204_v31 = vadd.f32 %v4462_v0, %v6051_v16 }
 0x22f   : > { %v2954_v54 = vpop.f32.mrb[31].mxu0  ;;  %v4852_v18 = vpop.eup %4851  ;;  %v3915_v7 = vpack.c.bf16 %v3244_v37, %v3243_v2  ;;  %v3155_v49 = vadd.f32 1.0, %v4850_v62  ;;  %4869 = vpow2.f32 %v3800_v23  ;;  %v3803_v3 = vmul.f32 -1.442695, %v6201_v10 }
 0x230   : > { %v4854_v29 = vpop.eup %4853  ;;  %v3910_v45 = vpack.c.bf16 %v3242_v5, %v3241_v61  ;;  %v3153_v41 = vadd.f32 1.0, %v4852_v18  ;;  %4871 = vpow2.f32 %v3798_v50  ;;  %v6209_v11 = vadd.f32 %v4463_v15, %v6051_v16 }
 0x231   : > { %v4856_v14 = vpop.eup %4855  ;;  %3963 = vst [vmem:[%s6138_s30 + $0x38] sm:$0xff] %v3915_v7   ;;  %4873 = vrcp.f32 %v3155_v49  ;;  %v3156_v19 = vadd.f32 1.0, %v4854_v29  ;;  %v3801_v24 = vmul.f32 -1.442695, %v6204_v31  ;;  %v4464_v51 = vadd.f32 %v2954_v54, %v2096_v58 }
 0x232   : > { %3962 = vst [vmem:[%s6138_s30 + $0x30] sm:$0xff] %v3910_v45   ;;  %4875 = vrcp.f32 %v3153_v41  ;;  %v3154_v13 = vadd.f32 1.0, %v4856_v14  ;;  %v4858_v39 = vpop.eup %4857  ;;  %v3804_v42 = vmul.f32 -1.442695, %v6209_v11 }
 0x233   : > { %4877 = vrcp.f32 %v3156_v19  ;;  %v6215_v63 = vadd.f32 %v4464_v51, %v6051_v16  ;;  %v3247_v60 = vmul.f32 %v4858_v39, %v6132_v21 }
 0x234   : > { %v4860_v26 = vpop.eup %4859  ;;  %4879 = vrcp.f32 %v3154_v13 }
 0x235   : > { %v4862_v8 = vpop.eup %4861  ;;  %4881 = vpow2.f32 %v3803_v3  ;;  %v3802_v25 = vmul.f32 -1.442695, %v6215_v63  ;;  %v3245_v28 = vmul.f32 %v4860_v26, %v6135_v9 }
 0x236   : > { %v4864_v6 = vpop.eup %4863  ;;  %v3248_v1 = vmul.f32 %v4862_v8, %v6145_v52  ;;  %4883 = vpow2.f32 %v3801_v24 }
 0x237   : > { %v4866_v40 = vpop.eup %4865  ;;  %v3246_v38 = vmul.f32 %v4864_v6, %v6148_v4  ;;  %4885 = vpow2.f32 %v3804_v42 }
 0x238   : > { %v4868_v16 = vpop.eup %4867  ;;  %v3925_v47 = vpack.c.bf16 %v3248_v1, %v3247_v60  ;;  %v3159_v32 = vadd.f32 1.0, %v4866_v40  ;;  %4887 = vpow2.f32 %v3802_v25 }
 0x239   : > { %v4870_v43 = vpop.eup %4869  ;;  %v3920_v12 = vpack.c.bf16 %v3246_v38, %v3245_v28  ;;  %v3157_v21 = vadd.f32 1.0, %v4868_v16 }
 0x23a   : > { %v4872_v23 = vpop.eup %4871  ;;  %3965 = vst [vmem:[%s6138_s30 + $0x48] sm:$0xff] %v3925_v47   ;;  %4889 = vrcp.f32 %v3159_v32  ;;  %v3160_v52 = vadd.f32 1.0, %v4870_v43 }
 0x23b   : > { %v4874_v35 = vpop.eup %4873  ;;  %3964 = vst [vmem:[%s6138_s30 + $0x40] sm:$0xff] %v3920_v12   ;;  %4891 = vrcp.f32 %v3157_v21  ;;  %v3158_v48 = vadd.f32 1.0, %v4872_v23 }
 0x23c   : > { %v4876_v46 = vpop.eup %4875  ;;  %4893 = vrcp.f32 %v3160_v52  ;;  %v3251_v2 = vmul.f32 %v4874_v35, %v6157_v53 }
 0x23d   : > { %v4878_v9 = vpop.eup %4877  ;;  %4895 = vrcp.f32 %v3158_v48  ;;  %v3249_v44 = vmul.f32 %v4876_v46, %v6160_v55 }
 0x23e   : > { %v4880_v4 = vpop.eup %4879  ;;  %v3252_v61 = vmul.f32 %v4878_v9, %v6167_v20 }
 0x23f   : > { %v4882_v56 = vpop.eup %4881  ;;  %v3250_v17 = vmul.f32 %v4880_v4, %v6171_v22 }
 0x240   : > { %v4884_v34 = vpop.eup %4883  ;;  %v3935_v37 = vpack.c.bf16 %v3252_v61, %v3251_v2  ;;  %v3163_v50 = vadd.f32 1.0, %v4882_v56 }
 0x241   : > { %v4886_v0 = vpop.eup %4885  ;;  %v3930_v33 = vpack.c.bf16 %v3250_v17, %v3249_v44  ;;  %v3161_v57 = vadd.f32 1.0, %v4884_v34 }
 0x242   : > { %v4888_v62 = vpop.eup %4887  ;;  %3967 = vst [vmem:[%s6138_s30 + $0x58] sm:$0xff] %v3935_v37   ;;  %4897 = vrcp.f32 %v3163_v50  ;;  %v3164_v5 = vadd.f32 1.0, %v4886_v0 }
 0x243   : > { %3966 = vst [vmem:[%s6138_s30 + $0x50] sm:$0xff] %v3930_v33   ;;  %4899 = vrcp.f32 %v3161_v57  ;;  %v3162_v53 = vadd.f32 1.0, %v4888_v62 }
 0x244   : > { %v4890_v20 = vpop.eup %4889  ;;  %4901 = vrcp.f32 %v3164_v5 }
 0x245   : > { %v4892_v55 = vpop.eup %4891  ;;  %4903 = vrcp.f32 %v3162_v53  ;;  %v3255_v58 = vmul.f32 %v4890_v20, %v6179_v30 }
 0x246   : > { %v4894_v22 = vpop.eup %4893  ;;  %v3253_v18 = vmul.f32 %v4892_v55, %v6182_v27 }
 0x247   : > { %v4896_v15 = vpop.eup %4895  ;;  %v3256_v54 = vmul.f32 %v4894_v22, %v6185_v36 }
 0x248   : > { %v3254_v7 = vmul.f32 %v4896_v15, %v6193_v59 }
 0x249   : > { %v3945_v49 = vpack.c.bf16 %v3256_v54, %v3255_v58 }
 0x24a   : > { %v3940_v29 = vpack.c.bf16 %v3254_v7, %v3253_v18 }
 0x24b   : > { %3969 = vst [vmem:[%s6138_s30 + $0x68] sm:$0xff] %v3945_v49  }
 0x24c   : > { %v4898_v45 = vpop.eup %4897  ;;  %3968 = vst [vmem:[%s6138_s30 + $0x60] sm:$0xff] %v3940_v29  }
 0x24d   : > { %v4900_v41 = vpop.eup %4899  ;;  %v3259_v36 = vmul.f32 %v4898_v45, %v6201_v10 }
 0x24e   : > { %v4902_v14 = vpop.eup %4901  ;;  %v3257_v59 = vmul.f32 %v4900_v41, %v6204_v31 }
 0x24f   : > { %v4904_v30 = vpop.eup %4903  ;;  %v3260_v27 = vmul.f32 %v4902_v14, %v6209_v11 }
 0x250   : > { %v3258_v19 = vmul.f32 %v4904_v30, %v6215_v63 }
 0x251   : > { %v3955_v3 = vpack.c.bf16 %v3260_v27, %v3259_v36 }
 0x252   : > { %v3950_v13 = vpack.c.bf16 %v3258_v19, %v3257_v59 }
 0x253   : > { %3971 = vst [vmem:[%s6138_s30 + $0x78] sm:$0xff] %v3955_v3  }
 0x254   : > { %3970 = vst [vmem:[%s6138_s30 + $0x70] sm:$0xff] %v3950_v13  }
 0x255   : > { %4922 = shalt.err (!%p4919_p5)
}
 0x256   : > { %s4923_s14 = scalar_lea.hbm %s6245_s7, 2048  ;;  %s4927_s24 = scalar_lea.hbm %s6303_s4, 4096 }
 0x257   : > { %p4924_p6 = scmp.ne.s32.totalorder %s6245_s7, %s4923_s14  ;;  %p4928_p10 = scmp.lt.u32.totalorder %s6245_s7, %s6303_s4 }
 0x258   : > { %p4929_p11 = scmp.lt.u32.totalorder %s4927_s24, %s4923_s14  ;;  %p4931_p13 = scmp.lt.u32.totalorder %s4923_s14, %s6245_s7 }
 0x259   : > { %p4925_p7 = pnand %p4924_p6, %p5057_p4 }
 0x25a   : > { %p4930_p12 = por %p4929_p11, %p4928_p10 }
 0x25b   : > { %p4926_p9 = pneg %p4925_p7 }
 0x25c   : > { %p4932_p0 = por %p4931_p13, %p4930_p12 }
 0x25e   : > { %p4933_p1 = pnand %p4932_p0, %p4926_p9 }
 0x260   : > { %4936 = shalt.err (!%p4933_p1)
}
 0x261   : > { %s4990_s30 = smov 64   ;;  %s4991_s5 = smov 4  }
 0x262   : > { %4701 = dma.vmem_to_hbm [thread:$0]  (%p5057_p4), %s6247_s6, 2048, %s6245_s7, %s6253_s18, %s4990_s30, %s4990_s30, %s4991_s5  }
 0x263 PF: > { %p4708_p2 = scmp.ge.s32.totalorder %s4987_s20, 2  ;;  %s3452_s8 = sand.u32 1, %s4967_s15  }
 0x264   : > { %s3453_s9 = scalar_lea.sflag [#allocation3], %s3452_s8 }
 0x265   : > { %p4704_p3 = pnand %p4708_p2, %p5064_p8 }
 0x267   : > { %4962 = dma.done.wait (!%p4704_p3), %s3453_s9, 2048  }
 0x268   : > { %4964 = vsyncadd (!%p4704_p3), %s3453_s9, 4294965248  ;;  %s17_s20 = sadd.s32 1, %s4987_s20   ;;  %s6383_s15 = smov %s4971_s16 }
 0x269   : > { %p14_p5 = scmp.ge.s32.totalorder %s17_s20, 4   ;;  %s6384_s16 = smov %s4975_s17 }
 0x26a   : > { %s6385_s17 = smov %s5070_s28  ;;  %s6386_s18 = smov %s4983_s19 }
 0x26b   : > { %s6387_s19 = smov %s6389_s23  ;;  %16 = sbr.rel (!%p14_p5) target bundleno = 4 (0x4), region = 82 }
 0x272   :  { %3458 = vsyncpa [#allocation3], 1 }
 0x273   :  { %3460 = vsyncpa [#allocation3 + $0x1], 1 }

</bundles_post_ra>
